<compile_context>
chip_gen: v5e
topology: v5e:2x2
jax: 0.10.0
libtpu: 0.0.40
codegen_flags: <defaults>
</compile_context>

<pallas_src>
import jax
import jax.numpy as jnp
from jax.experimental import pallas as pl
from jax.experimental.pallas import tpu as pltpu

INPUT_DIM = 28 * 28      # 784
REDUCED_DIM = 32         # nn.Linear(input_dim, 32)
HIDDEN_DIM = 64
OUTPUT_DIM = 10
NUM_BASIS = 10
DOMAIN_MIN, DOMAIN_MAX = -1.0, 1.0
WIDTH = (DOMAIN_MAX - DOMAIN_MIN) / (NUM_BASIS - 1)
INV_WIDTH = 1.0 / WIDTH
# Trace-time constants: linspace(-1, 1, 10) centers, pre-scaled by 1/width.
CENTERS = tuple(DOMAIN_MIN + k * WIDTH for k in range(NUM_BASIS))
SCALED_CENTERS = tuple(c * INV_WIDTH for c in CENTERS)

LANE = 128                       # every feature axis padded to the 128-lane width
KDIM = NUM_BASIS * LANE          # 1280: fused contraction depth per KAN layer
TILE_B_MAX = 512                 # batch tile (mult of 16); ~8 MB VMEM footprint


def _round_up(n, m):
    return ((n + m - 1) // m) * m


def _basis_all(a_f32):
    """Triangular B-spline basis for all 10 centers, lane-concatenated.

    Basis math stays in f32 on the VPU; each 128-lane block is cast to bf16
    (MXU operand dtype) and concatenated along lanes -> (tb, 1280) bf16.
    Each block occupies its own 128-lane vreg column group, so the concat is
    pure lane placement (no cross-lane moves).
    """
    s = a_f32 * INV_WIDTH                                      # hoisted 1/width
    blocks = [
        jnp.maximum(1.0 - jnp.abs(s - SCALED_CENTERS[k]), 0.0).astype(jnp.bfloat16)
        for k in range(NUM_BASIS)                              # static unroll (10)
    ]
    return jnp.concatenate(blocks, axis=-1)                    # (tb, 1280) bf16


def mnist_kan_kernel(x_ref, wl_ref, bl_ref, wk1_ref, bk1_ref, wk2_ref, bk2_ref,
                     o_ref):
    # ---- dim_reduction: Linear(784, 32 -> padded 128) + ReLU (bf16 MXU) ----
    h = jnp.dot(x_ref[...], wl_ref[...],
                preferred_element_type=jnp.float32) + bl_ref[...]
    h = jnp.clip(h, 0.0, 1.0)        # fused ReLU + clamp(-1, 1) (relu => [0, 1])

    # ---- KAN layer 1: one K=1280 bf16 matmul, f32 accumulate ----
    g = jnp.dot(_basis_all(h), wk1_ref[...],
                preferred_element_type=jnp.float32) + bk1_ref[...]
    g = jnp.clip(g, 0.0, 1.0)        # fused ReLU + clamp

    # ---- KAN layer 2: lane-dense store; cols 10..127 are exact zeros ----
    o_ref[...] = jnp.dot(_basis_all(g), wk2_ref[...],
                         preferred_element_type=jnp.float32) + bk2_ref[...]


def init_params(key):
    """Logical (un-padded) f32 parameters matching the PyTorch module shapes."""
    k0, k1, k2, k3 = jax.random.split(key, 4)
    f32 = jnp.float32
    lim = 1.0 / (INPUT_DIM ** 0.5)
    wl = jax.random.uniform(k0, (INPUT_DIM, REDUCED_DIM), minval=-lim, maxval=lim,
                            dtype=f32)
    bl = jax.random.uniform(k3, (REDUCED_DIM,), minval=-lim, maxval=lim, dtype=f32)
    wk1 = jax.random.uniform(k1, (NUM_BASIS, REDUCED_DIM, HIDDEN_DIM),
                             minval=-0.1, maxval=0.1, dtype=f32)
    bk1 = jnp.zeros((HIDDEN_DIM,), f32)
    wk2 = jax.random.uniform(k2, (NUM_BASIS, HIDDEN_DIM, OUTPUT_DIM),
                             minval=-0.1, maxval=0.1, dtype=f32)
    bk2 = jnp.zeros((OUTPUT_DIM,), f32)
    return (wl, bl, wk1, bk1, wk2, bk2)


def pack_params(params):
    """Zero-pad feature axes to 128 lanes, cast matmul weights to bf16, and
    flatten each KAN weight tensor to its (NUM_BASIS*128, 128) long-K layout.

    Zero padding of weight ROWS guarantees padded activation lanes (which have
    nonzero basis values near center 0) contribute exactly nothing; zero weight
    COLUMNS + zero bias keep output lanes 10..127 exactly zero.
    """
    wl, bl, wk1, bk1, wk2, bk2 = params
    f32, bf16 = jnp.float32, jnp.bfloat16
    wl_p = jnp.zeros((INPUT_DIM, LANE), f32).at[:, :REDUCED_DIM].set(wl).astype(bf16)
    bl_p = jnp.zeros((1, LANE), f32).at[0, :REDUCED_DIM].set(bl)
    wk1_p = jnp.zeros((NUM_BASIS, LANE, LANE), f32
                      ).at[:, :REDUCED_DIM, :HIDDEN_DIM].set(wk1)
    wk1_f = wk1_p.reshape(KDIM, LANE).astype(bf16)      # row k*128+i == basis_k, in i
    bk1_p = jnp.zeros((1, LANE), f32).at[0, :HIDDEN_DIM].set(bk1)
    wk2_p = jnp.zeros((NUM_BASIS, LANE, LANE), f32
                      ).at[:, :HIDDEN_DIM, :OUTPUT_DIM].set(wk2)
    wk2_f = wk2_p.reshape(KDIM, LANE).astype(bf16)
    bk2_p = jnp.zeros((1, LANE), f32).at[0, :OUTPUT_DIM].set(bk2)
    return (wl_p, bl_p, wk1_f, bk1_p, wk2_f, bk2_p)


def mnist_kan_forward(x, packed_params, tile_b=TILE_B_MAX):
    B = x.shape[0]
    x2 = x.reshape(B, -1).astype(jnp.bfloat16)                 # x.view(B, -1), bf16
    assert x2.shape[1] == INPUT_DIM

    # Batch tile: multiple of 16 (bf16 sublane packing); capped so the grid has
    # >= 2 steps whenever the batch allows it (v7x megacore sharding).
    b16 = _round_up(B, 16)
    tb = min(_round_up(min(tile_b, TILE_B_MAX), 16),
             max(16, _round_up(b16 // 2, 16)))
    Bp = _round_up(b16, tb)
    if Bp != B:
        x2 = jnp.pad(x2, ((0, Bp - B), (0, 0)))
    num_tiles = Bp // tb

    def resident(a):
        # Constant block index -> DMA'd once, stays VMEM-resident across steps.
        return pl.BlockSpec(a.shape, lambda i: (0, 0))

    out = pl.pallas_call(
        mnist_kan_kernel,
        out_shape=jax.ShapeDtypeStruct((Bp, LANE), jnp.float32),
        grid=(num_tiles,),
        in_specs=[pl.BlockSpec((tb, INPUT_DIM), lambda i: (i, 0))]
                 + [resident(a) for a in packed_params],
        out_specs=pl.BlockSpec((tb, LANE), lambda i: (i, 0)),
        compiler_params=pltpu.CompilerParams(
            dimension_semantics=("parallel",),      # megacore sharding on v7x
            vmem_limit_bytes=32 * 1024 * 1024),     # headroom on v5e's 16 MiB default
    )(x2, *packed_params)
    return out[:B, :OUTPUT_DIM]


def mnist_kan_reference(x, params):
    """Pure-JAX f32 reference mirroring the PyTorch forward (logical weights)."""
    wl, bl, wk1, bk1, wk2, bk2 = params
    B = x.shape[0]
    centers = jnp.asarray(CENTERS, jnp.float32)

    def kan(a, w, b):
        a = jnp.clip(a, DOMAIN_MIN, DOMAIN_MAX)
        z = jnp.maximum(
            1.0 - jnp.abs((a[:, :, None] - centers[None, None, :]) / WIDTH), 0.0)
        return jnp.einsum('bik,kio->bo', z, w) + b

    h = jnp.maximum(x.reshape(B, -1) @ wl + bl, 0.0)
    g = jnp.maximum(kan(h, wk1, bk1), 0.0)
    return kan(g, wk2, bk2)


if __name__ == "__main__":
    key = jax.random.PRNGKey(0)
    k_param, k_x = jax.random.split(key)
    params = init_params(k_param)
    packed = pack_params(params)

    B = 128  # module's batch_size; tile_b=32 -> 4 grid steps exercises tiling
    x = jax.random.uniform(k_x, (B, 1, 28, 28), minval=-1.0, maxval=1.0,
                           dtype=jnp.float32)

    out = mnist_kan_forward(x, packed, tile_b=32)
    out = jax.block_until_ready(out)

    ref = mnist_kan_reference(x, params)
    assert out.shape == (B, OUTPUT_DIM)
    # bf16 MXU path vs f32 reference: relaxed tolerance (f32 version matched
    # at 1e-5; bf16 weights/x/basis shift logits by O(1e-2) near basis kinks).
    err = float(jnp.max(jnp.abs(out - ref)))
    assert err < 1e-1, err
    print("KERNEL_OK")
</pallas_src>

<mosaic_0001>
module attributes {stable_mosaic.version = 11 : i64} {
  func.func @mnist_kan_kernel(%arg0: i32, %arg1: memref<32x784xbf16, #tpu.memory_space<vmem>>, %arg2: memref<784x128xbf16, #tpu.memory_space<vmem>>, %arg3: memref<1x128xf32, #tpu.memory_space<vmem>>, %arg4: memref<1280x128xbf16, #tpu.memory_space<vmem>>, %arg5: memref<1x128xf32, #tpu.memory_space<vmem>>, %arg6: memref<1280x128xbf16, #tpu.memory_space<vmem>>, %arg7: memref<1x128xf32, #tpu.memory_space<vmem>>, %arg8: memref<32x128xf32, #tpu.memory_space<vmem>>) attributes {dimension_semantics = [#tpu.dimension_semantics<parallel>], iteration_bounds = array<i64: 4>, scalar_prefetch = 0 : i64, scratch_operands = 0 : i64, tpu.core_type = #tpu.core_type<tc>, window_params = [{transform_indices = @transform_0, window_bounds = array<i64: 32, 784>}, {pipeline_mode = #tpu.pipeline_mode<synchronous>, transform_indices = @transform_1, window_bounds = array<i64: 784, 128>}, {pipeline_mode = #tpu.pipeline_mode<synchronous>, transform_indices = @transform_2, window_bounds = array<i64: 1, 128>}, {pipeline_mode = #tpu.pipeline_mode<synchronous>, transform_indices = @transform_3, window_bounds = array<i64: 1280, 128>}, {pipeline_mode = #tpu.pipeline_mode<synchronous>, transform_indices = @transform_4, window_bounds = array<i64: 1, 128>}, {pipeline_mode = #tpu.pipeline_mode<synchronous>, transform_indices = @transform_5, window_bounds = array<i64: 1280, 128>}, {pipeline_mode = #tpu.pipeline_mode<synchronous>, transform_indices = @transform_6, window_bounds = array<i64: 1, 128>}, {transform_indices = @transform_7, window_bounds = array<i64: 32, 128>}]} {
    %c0 = arith.constant 0 : index
    %c0_0 = arith.constant 0 : index
    %0 = vector.load %arg1[%c0, %c0_0] : memref<32x784xbf16, #tpu.memory_space<vmem>>, vector<32x784xbf16>
    %c0_1 = arith.constant 0 : index
    %c0_2 = arith.constant 0 : index
    %1 = vector.load %arg2[%c0_1, %c0_2] : memref<784x128xbf16, #tpu.memory_space<vmem>>, vector<784x128xbf16>
    %cst = arith.constant dense<0.000000e+00> : vector<32x128xf32>
    %2 = tpu.matmul %0, %1, %cst {dimension_numbers = #tpu.dot_dimension_numbers<[1], [0], [0], [1], [0, 0, 1, 1], [], []>} : vector<32x784xbf16>, vector<784x128xbf16>, vector<32x128xf32> -> vector<32x128xf32>
    %c0_3 = arith.constant 0 : index
    %c0_4 = arith.constant 0 : index
    %3 = vector.load %arg3[%c0_3, %c0_4] : memref<1x128xf32, #tpu.memory_space<vmem>>, vector<1x128xf32>
    %4 = vector.broadcast %3 : vector<1x128xf32> to vector<32x128xf32>
    %5 = arith.addf %2, %4 : vector<32x128xf32>
    %cst_5 = arith.constant 0.000000e+00 : f32
    %cst_6 = arith.constant 1.000000e+00 : f32
    %6 = vector.broadcast %cst_5 : f32 to vector<32x128xf32>
    %7 = arith.maximumf %6, %5 : vector<32x128xf32>
    %8 = vector.broadcast %cst_6 : f32 to vector<32x128xf32>
    %9 = arith.minimumf %8, %7 : vector<32x128xf32>
    %cst_7 = arith.constant 4.500000e+00 : f32
    %10 = vector.broadcast %cst_7 : f32 to vector<32x128xf32>
    %11 = arith.mulf %9, %10 : vector<32x128xf32>
    %cst_8 = arith.constant -4.500000e+00 : f32
    %12 = vector.broadcast %cst_8 : f32 to vector<32x128xf32>
    %13 = arith.subf %11, %12 : vector<32x128xf32>
    %14 = math.absf %13 : vector<32x128xf32>
    %cst_9 = arith.constant 1.000000e+00 : f32
    %15 = vector.broadcast %cst_9 : f32 to vector<32x128xf32>
    %16 = arith.subf %15, %14 : vector<32x128xf32>
    %cst_10 = arith.constant 0.000000e+00 : f32
    %17 = vector.broadcast %cst_10 : f32 to vector<32x128xf32>
    %18 = arith.maximumf %16, %17 : vector<32x128xf32>
    %19 = arith.truncf %18 : vector<32x128xf32> to vector<32x128xbf16>
    %cst_11 = arith.constant -3.500000e+00 : f32
    %20 = vector.broadcast %cst_11 : f32 to vector<32x128xf32>
    %21 = arith.subf %11, %20 : vector<32x128xf32>
    %22 = math.absf %21 : vector<32x128xf32>
    %cst_12 = arith.constant 1.000000e+00 : f32
    %23 = vector.broadcast %cst_12 : f32 to vector<32x128xf32>
    %24 = arith.subf %23, %22 : vector<32x128xf32>
    %cst_13 = arith.constant 0.000000e+00 : f32
    %25 = vector.broadcast %cst_13 : f32 to vector<32x128xf32>
    %26 = arith.maximumf %24, %25 : vector<32x128xf32>
    %27 = arith.truncf %26 : vector<32x128xf32> to vector<32x128xbf16>
    %cst_14 = arith.constant -2.500000e+00 : f32
    %28 = vector.broadcast %cst_14 : f32 to vector<32x128xf32>
    %29 = arith.subf %11, %28 : vector<32x128xf32>
    %30 = math.absf %29 : vector<32x128xf32>
    %cst_15 = arith.constant 1.000000e+00 : f32
    %31 = vector.broadcast %cst_15 : f32 to vector<32x128xf32>
    %32 = arith.subf %31, %30 : vector<32x128xf32>
    %cst_16 = arith.constant 0.000000e+00 : f32
    %33 = vector.broadcast %cst_16 : f32 to vector<32x128xf32>
    %34 = arith.maximumf %32, %33 : vector<32x128xf32>
    %35 = arith.truncf %34 : vector<32x128xf32> to vector<32x128xbf16>
    %cst_17 = arith.constant -1.500000e+00 : f32
    %36 = vector.broadcast %cst_17 : f32 to vector<32x128xf32>
    %37 = arith.subf %11, %36 : vector<32x128xf32>
    %38 = math.absf %37 : vector<32x128xf32>
    %cst_18 = arith.constant 1.000000e+00 : f32
    %39 = vector.broadcast %cst_18 : f32 to vector<32x128xf32>
    %40 = arith.subf %39, %38 : vector<32x128xf32>
    %cst_19 = arith.constant 0.000000e+00 : f32
    %41 = vector.broadcast %cst_19 : f32 to vector<32x128xf32>
    %42 = arith.maximumf %40, %41 : vector<32x128xf32>
    %43 = arith.truncf %42 : vector<32x128xf32> to vector<32x128xbf16>
    %cst_20 = arith.constant -5.000000e-01 : f32
    %44 = vector.broadcast %cst_20 : f32 to vector<32x128xf32>
    %45 = arith.subf %11, %44 : vector<32x128xf32>
    %46 = math.absf %45 : vector<32x128xf32>
    %cst_21 = arith.constant 1.000000e+00 : f32
    %47 = vector.broadcast %cst_21 : f32 to vector<32x128xf32>
    %48 = arith.subf %47, %46 : vector<32x128xf32>
    %cst_22 = arith.constant 0.000000e+00 : f32
    %49 = vector.broadcast %cst_22 : f32 to vector<32x128xf32>
    %50 = arith.maximumf %48, %49 : vector<32x128xf32>
    %51 = arith.truncf %50 : vector<32x128xf32> to vector<32x128xbf16>
    %cst_23 = arith.constant 5.000000e-01 : f32
    %52 = vector.broadcast %cst_23 : f32 to vector<32x128xf32>
    %53 = arith.subf %11, %52 : vector<32x128xf32>
    %54 = math.absf %53 : vector<32x128xf32>
    %cst_24 = arith.constant 1.000000e+00 : f32
    %55 = vector.broadcast %cst_24 : f32 to vector<32x128xf32>
    %56 = arith.subf %55, %54 : vector<32x128xf32>
    %cst_25 = arith.constant 0.000000e+00 : f32
    %57 = vector.broadcast %cst_25 : f32 to vector<32x128xf32>
    %58 = arith.maximumf %56, %57 : vector<32x128xf32>
    %59 = arith.truncf %58 : vector<32x128xf32> to vector<32x128xbf16>
    %cst_26 = arith.constant 1.500000e+00 : f32
    %60 = vector.broadcast %cst_26 : f32 to vector<32x128xf32>
    %61 = arith.subf %11, %60 : vector<32x128xf32>
    %62 = math.absf %61 : vector<32x128xf32>
    %cst_27 = arith.constant 1.000000e+00 : f32
    %63 = vector.broadcast %cst_27 : f32 to vector<32x128xf32>
    %64 = arith.subf %63, %62 : vector<32x128xf32>
    %cst_28 = arith.constant 0.000000e+00 : f32
    %65 = vector.broadcast %cst_28 : f32 to vector<32x128xf32>
    %66 = arith.maximumf %64, %65 : vector<32x128xf32>
    %67 = arith.truncf %66 : vector<32x128xf32> to vector<32x128xbf16>
    %cst_29 = arith.constant 2.500000e+00 : f32
    %68 = vector.broadcast %cst_29 : f32 to vector<32x128xf32>
    %69 = arith.subf %11, %68 : vector<32x128xf32>
    %70 = math.absf %69 : vector<32x128xf32>
    %cst_30 = arith.constant 1.000000e+00 : f32
    %71 = vector.broadcast %cst_30 : f32 to vector<32x128xf32>
    %72 = arith.subf %71, %70 : vector<32x128xf32>
    %cst_31 = arith.constant 0.000000e+00 : f32
    %73 = vector.broadcast %cst_31 : f32 to vector<32x128xf32>
    %74 = arith.maximumf %72, %73 : vector<32x128xf32>
    %75 = arith.truncf %74 : vector<32x128xf32> to vector<32x128xbf16>
    %cst_32 = arith.constant 3.500000e+00 : f32
    %76 = vector.broadcast %cst_32 : f32 to vector<32x128xf32>
    %77 = arith.subf %11, %76 : vector<32x128xf32>
    %78 = math.absf %77 : vector<32x128xf32>
    %cst_33 = arith.constant 1.000000e+00 : f32
    %79 = vector.broadcast %cst_33 : f32 to vector<32x128xf32>
    %80 = arith.subf %79, %78 : vector<32x128xf32>
    %cst_34 = arith.constant 0.000000e+00 : f32
    %81 = vector.broadcast %cst_34 : f32 to vector<32x128xf32>
    %82 = arith.maximumf %80, %81 : vector<32x128xf32>
    %83 = arith.truncf %82 : vector<32x128xf32> to vector<32x128xbf16>
    %cst_35 = arith.constant 4.500000e+00 : f32
    %84 = vector.broadcast %cst_35 : f32 to vector<32x128xf32>
    %85 = arith.subf %11, %84 : vector<32x128xf32>
    %86 = math.absf %85 : vector<32x128xf32>
    %cst_36 = arith.constant 1.000000e+00 : f32
    %87 = vector.broadcast %cst_36 : f32 to vector<32x128xf32>
    %88 = arith.subf %87, %86 : vector<32x128xf32>
    %cst_37 = arith.constant 0.000000e+00 : f32
    %89 = vector.broadcast %cst_37 : f32 to vector<32x128xf32>
    %90 = arith.maximumf %88, %89 : vector<32x128xf32>
    %91 = arith.truncf %90 : vector<32x128xf32> to vector<32x128xbf16>
    %92 = tpu.concatenate %19, %27, %35, %43, %51, %59, %67, %75, %83, %91 in 1 : vector<32x128xbf16>, vector<32x128xbf16>, vector<32x128xbf16>, vector<32x128xbf16>, vector<32x128xbf16>, vector<32x128xbf16>, vector<32x128xbf16>, vector<32x128xbf16>, vector<32x128xbf16>, vector<32x128xbf16> -> vector<32x1280xbf16>
    %c0_38 = arith.constant 0 : index
    %c0_39 = arith.constant 0 : index
    %93 = vector.load %arg4[%c0_38, %c0_39] : memref<1280x128xbf16, #tpu.memory_space<vmem>>, vector<1280x128xbf16>
    %cst_40 = arith.constant dense<0.000000e+00> : vector<32x128xf32>
    %94 = tpu.matmul %92, %93, %cst_40 {dimension_numbers = #tpu.dot_dimension_numbers<[1], [0], [0], [1], [0, 0, 1, 1], [], []>} : vector<32x1280xbf16>, vector<1280x128xbf16>, vector<32x128xf32> -> vector<32x128xf32>
    %c0_41 = arith.constant 0 : index
    %c0_42 = arith.constant 0 : index
    %95 = vector.load %arg5[%c0_41, %c0_42] : memref<1x128xf32, #tpu.memory_space<vmem>>, vector<1x128xf32>
    %96 = vector.broadcast %95 : vector<1x128xf32> to vector<32x128xf32>
    %97 = arith.addf %94, %96 : vector<32x128xf32>
    %cst_43 = arith.constant 0.000000e+00 : f32
    %cst_44 = arith.constant 1.000000e+00 : f32
    %98 = vector.broadcast %cst_43 : f32 to vector<32x128xf32>
    %99 = arith.maximumf %98, %97 : vector<32x128xf32>
    %100 = vector.broadcast %cst_44 : f32 to vector<32x128xf32>
    %101 = arith.minimumf %100, %99 : vector<32x128xf32>
    %cst_45 = arith.constant 4.500000e+00 : f32
    %102 = vector.broadcast %cst_45 : f32 to vector<32x128xf32>
    %103 = arith.mulf %101, %102 : vector<32x128xf32>
    %cst_46 = arith.constant -4.500000e+00 : f32
    %104 = vector.broadcast %cst_46 : f32 to vector<32x128xf32>
    %105 = arith.subf %103, %104 : vector<32x128xf32>
    %106 = math.absf %105 : vector<32x128xf32>
    %cst_47 = arith.constant 1.000000e+00 : f32
    %107 = vector.broadcast %cst_47 : f32 to vector<32x128xf32>
    %108 = arith.subf %107, %106 : vector<32x128xf32>
    %cst_48 = arith.constant 0.000000e+00 : f32
    %109 = vector.broadcast %cst_48 : f32 to vector<32x128xf32>
    %110 = arith.maximumf %108, %109 : vector<32x128xf32>
    %111 = arith.truncf %110 : vector<32x128xf32> to vector<32x128xbf16>
    %cst_49 = arith.constant -3.500000e+00 : f32
    %112 = vector.broadcast %cst_49 : f32 to vector<32x128xf32>
    %113 = arith.subf %103, %112 : vector<32x128xf32>
    %114 = math.absf %113 : vector<32x128xf32>
    %cst_50 = arith.constant 1.000000e+00 : f32
    %115 = vector.broadcast %cst_50 : f32 to vector<32x128xf32>
    %116 = arith.subf %115, %114 : vector<32x128xf32>
    %cst_51 = arith.constant 0.000000e+00 : f32
    %117 = vector.broadcast %cst_51 : f32 to vector<32x128xf32>
    %118 = arith.maximumf %116, %117 : vector<32x128xf32>
    %119 = arith.truncf %118 : vector<32x128xf32> to vector<32x128xbf16>
    %cst_52 = arith.constant -2.500000e+00 : f32
    %120 = vector.broadcast %cst_52 : f32 to vector<32x128xf32>
    %121 = arith.subf %103, %120 : vector<32x128xf32>
    %122 = math.absf %121 : vector<32x128xf32>
    %cst_53 = arith.constant 1.000000e+00 : f32
    %123 = vector.broadcast %cst_53 : f32 to vector<32x128xf32>
    %124 = arith.subf %123, %122 : vector<32x128xf32>
    %cst_54 = arith.constant 0.000000e+00 : f32
    %125 = vector.broadcast %cst_54 : f32 to vector<32x128xf32>
    %126 = arith.maximumf %124, %125 : vector<32x128xf32>
    %127 = arith.truncf %126 : vector<32x128xf32> to vector<32x128xbf16>
    %cst_55 = arith.constant -1.500000e+00 : f32
    %128 = vector.broadcast %cst_55 : f32 to vector<32x128xf32>
    %129 = arith.subf %103, %128 : vector<32x128xf32>
    %130 = math.absf %129 : vector<32x128xf32>
    %cst_56 = arith.constant 1.000000e+00 : f32
    %131 = vector.broadcast %cst_56 : f32 to vector<32x128xf32>
    %132 = arith.subf %131, %130 : vector<32x128xf32>
    %cst_57 = arith.constant 0.000000e+00 : f32
    %133 = vector.broadcast %cst_57 : f32 to vector<32x128xf32>
    %134 = arith.maximumf %132, %133 : vector<32x128xf32>
    %135 = arith.truncf %134 : vector<32x128xf32> to vector<32x128xbf16>
    %cst_58 = arith.constant -5.000000e-01 : f32
    %136 = vector.broadcast %cst_58 : f32 to vector<32x128xf32>
    %137 = arith.subf %103, %136 : vector<32x128xf32>
    %138 = math.absf %137 : vector<32x128xf32>
    %cst_59 = arith.constant 1.000000e+00 : f32
    %139 = vector.broadcast %cst_59 : f32 to vector<32x128xf32>
    %140 = arith.subf %139, %138 : vector<32x128xf32>
    %cst_60 = arith.constant 0.000000e+00 : f32
    %141 = vector.broadcast %cst_60 : f32 to vector<32x128xf32>
    %142 = arith.maximumf %140, %141 : vector<32x128xf32>
    %143 = arith.truncf %142 : vector<32x128xf32> to vector<32x128xbf16>
    %cst_61 = arith.constant 5.000000e-01 : f32
    %144 = vector.broadcast %cst_61 : f32 to vector<32x128xf32>
    %145 = arith.subf %103, %144 : vector<32x128xf32>
    %146 = math.absf %145 : vector<32x128xf32>
    %cst_62 = arith.constant 1.000000e+00 : f32
    %147 = vector.broadcast %cst_62 : f32 to vector<32x128xf32>
    %148 = arith.subf %147, %146 : vector<32x128xf32>
    %cst_63 = arith.constant 0.000000e+00 : f32
    %149 = vector.broadcast %cst_63 : f32 to vector<32x128xf32>
    %150 = arith.maximumf %148, %149 : vector<32x128xf32>
    %151 = arith.truncf %150 : vector<32x128xf32> to vector<32x128xbf16>
    %cst_64 = arith.constant 1.500000e+00 : f32
    %152 = vector.broadcast %cst_64 : f32 to vector<32x128xf32>
    %153 = arith.subf %103, %152 : vector<32x128xf32>
    %154 = math.absf %153 : vector<32x128xf32>
    %cst_65 = arith.constant 1.000000e+00 : f32
    %155 = vector.broadcast %cst_65 : f32 to vector<32x128xf32>
    %156 = arith.subf %155, %154 : vector<32x128xf32>
    %cst_66 = arith.constant 0.000000e+00 : f32
    %157 = vector.broadcast %cst_66 : f32 to vector<32x128xf32>
    %158 = arith.maximumf %156, %157 : vector<32x128xf32>
    %159 = arith.truncf %158 : vector<32x128xf32> to vector<32x128xbf16>
    %cst_67 = arith.constant 2.500000e+00 : f32
    %160 = vector.broadcast %cst_67 : f32 to vector<32x128xf32>
    %161 = arith.subf %103, %160 : vector<32x128xf32>
    %162 = math.absf %161 : vector<32x128xf32>
    %cst_68 = arith.constant 1.000000e+00 : f32
    %163 = vector.broadcast %cst_68 : f32 to vector<32x128xf32>
    %164 = arith.subf %163, %162 : vector<32x128xf32>
    %cst_69 = arith.constant 0.000000e+00 : f32
    %165 = vector.broadcast %cst_69 : f32 to vector<32x128xf32>
    %166 = arith.maximumf %164, %165 : vector<32x128xf32>
    %167 = arith.truncf %166 : vector<32x128xf32> to vector<32x128xbf16>
    %cst_70 = arith.constant 3.500000e+00 : f32
    %168 = vector.broadcast %cst_70 : f32 to vector<32x128xf32>
    %169 = arith.subf %103, %168 : vector<32x128xf32>
    %170 = math.absf %169 : vector<32x128xf32>
    %cst_71 = arith.constant 1.000000e+00 : f32
    %171 = vector.broadcast %cst_71 : f32 to vector<32x128xf32>
    %172 = arith.subf %171, %170 : vector<32x128xf32>
    %cst_72 = arith.constant 0.000000e+00 : f32
    %173 = vector.broadcast %cst_72 : f32 to vector<32x128xf32>
    %174 = arith.maximumf %172, %173 : vector<32x128xf32>
    %175 = arith.truncf %174 : vector<32x128xf32> to vector<32x128xbf16>
    %cst_73 = arith.constant 4.500000e+00 : f32
    %176 = vector.broadcast %cst_73 : f32 to vector<32x128xf32>
    %177 = arith.subf %103, %176 : vector<32x128xf32>
    %178 = math.absf %177 : vector<32x128xf32>
    %cst_74 = arith.constant 1.000000e+00 : f32
    %179 = vector.broadcast %cst_74 : f32 to vector<32x128xf32>
    %180 = arith.subf %179, %178 : vector<32x128xf32>
    %cst_75 = arith.constant 0.000000e+00 : f32
    %181 = vector.broadcast %cst_75 : f32 to vector<32x128xf32>
    %182 = arith.maximumf %180, %181 : vector<32x128xf32>
    %183 = arith.truncf %182 : vector<32x128xf32> to vector<32x128xbf16>
    %184 = tpu.concatenate %111, %119, %127, %135, %143, %151, %159, %167, %175, %183 in 1 : vector<32x128xbf16>, vector<32x128xbf16>, vector<32x128xbf16>, vector<32x128xbf16>, vector<32x128xbf16>, vector<32x128xbf16>, vector<32x128xbf16>, vector<32x128xbf16>, vector<32x128xbf16>, vector<32x128xbf16> -> vector<32x1280xbf16>
    %c0_76 = arith.constant 0 : index
    %c0_77 = arith.constant 0 : index
    %185 = vector.load %arg6[%c0_76, %c0_77] : memref<1280x128xbf16, #tpu.memory_space<vmem>>, vector<1280x128xbf16>
    %cst_78 = arith.constant dense<0.000000e+00> : vector<32x128xf32>
    %186 = tpu.matmul %184, %185, %cst_78 {dimension_numbers = #tpu.dot_dimension_numbers<[1], [0], [0], [1], [0, 0, 1, 1], [], []>} : vector<32x1280xbf16>, vector<1280x128xbf16>, vector<32x128xf32> -> vector<32x128xf32>
    %c0_79 = arith.constant 0 : index
    %c0_80 = arith.constant 0 : index
    %187 = vector.load %arg7[%c0_79, %c0_80] : memref<1x128xf32, #tpu.memory_space<vmem>>, vector<1x128xf32>
    %188 = vector.broadcast %187 : vector<1x128xf32> to vector<32x128xf32>
    %189 = arith.addf %186, %188 : vector<32x128xf32>
    %c0_81 = arith.constant 0 : index
    %c0_82 = arith.constant 0 : index
    %190 = vector.load %arg8[%c0_81, %c0_82] : memref<32x128xf32, #tpu.memory_space<vmem>>, vector<32x128xf32>
    tpu.vector_store %arg8[%c0_81, %c0_82], %189 {strides = array<i32>} : memref<32x128xf32, #tpu.memory_space<vmem>>, vector<32x128xf32>,
    return
  }
  func.func @transform_0(%arg0: i32) -> (i32, i32) {
    %c0_i32 = arith.constant 0 : i32
    %c0_i32_0 = arith.constant 0 : i32
    return %arg0, %c0_i32 : i32, i32
  }
  func.func @transform_1(%arg0: i32) -> (i32, i32) {
    %c0_i32 = arith.constant 0 : i32
    %c0_i32_0 = arith.constant 0 : i32
    %c0_i32_1 = arith.constant 0 : i32
    return %c0_i32, %c0_i32_0 : i32, i32
  }
  func.func @transform_2(%arg0: i32) -> (i32, i32) {
    %c0_i32 = arith.constant 0 : i32
    %c0_i32_0 = arith.constant 0 : i32
    %c0_i32_1 = arith.constant 0 : i32
    return %c0_i32, %c0_i32_0 : i32, i32
  }
  func.func @transform_3(%arg0: i32) -> (i32, i32) {
    %c0_i32 = arith.constant 0 : i32
    %c0_i32_0 = arith.constant 0 : i32
    %c0_i32_1 = arith.constant 0 : i32
    return %c0_i32, %c0_i32_0 : i32, i32
  }
  func.func @transform_4(%arg0: i32) -> (i32, i32) {
    %c0_i32 = arith.constant 0 : i32
    %c0_i32_0 = arith.constant 0 : i32
    %c0_i32_1 = arith.constant 0 : i32
    return %c0_i32, %c0_i32_0 : i32, i32
  }
  func.func @transform_5(%arg0: i32) -> (i32, i32) {
    %c0_i32 = arith.constant 0 : i32
    %c0_i32_0 = arith.constant 0 : i32
    %c0_i32_1 = arith.constant 0 : i32
    return %c0_i32, %c0_i32_0 : i32, i32
  }
  func.func @transform_6(%arg0: i32) -> (i32, i32) {
    %c0_i32 = arith.constant 0 : i32
    %c0_i32_0 = arith.constant 0 : i32
    %c0_i32_1 = arith.constant 0 : i32
    return %c0_i32, %c0_i32_0 : i32, i32
  }
  func.func @transform_7(%arg0: i32) -> (i32, i32) {
    %c0_i32 = arith.constant 0 : i32
    %c0_i32_0 = arith.constant 0 : i32
    return %arg0, %c0_i32 : i32, i32
  }
}

</mosaic_0001>

<bundles_post_ra>
// kernel: tpu_custom_call.1
= control target key start
LH: loop header
LB: loop body
LE: loop exit
PB: predicated region body
PF: predicated region fallthrough
CT: control target
= control target key end

     0   :  { %12 = vsyncpa [#allocation3], 0  ;;  %s5473_s0 = inlined_call_operand.vmem [shape: bf16[128,784], index: 0, kind: input, shape index: {}]   ;;  %s5474_s1 = inlined_call_operand.hbm [shape: bf16[784,128], index: 1, kind: input, shape index: {}]   ;;  %s5475_s2 = inlined_call_operand.vmem [shape: f32[1,128], index: 2, kind: input, shape index: {}]   ;;  %s5476_s3 = inlined_call_operand.vmem [shape: bf16[1280,128], index: 3, kind: input, shape index: {}]   ;;  %s5477_s4 = inlined_call_operand.vmem [shape: f32[1,128], index: 4, kind: input, shape index: {}]   ;;  %s5478_s5 = inlined_call_operand.hbm [shape: bf16[1280,128], index: 5, kind: input, shape index: {}]   ;;  %s5479_s6 = inlined_call_operand.vmem [shape: f32[1,128], index: 6, kind: input, shape index: {}]   ;;  %s5480_s7 = inlined_call_operand.hbm [shape: f32[128,128], index: 7, kind: output, shape index: {}]  }
   0x1   :  { %13 = vsyncpa [#allocation6], 0 }
   0x2   :  { %14 = vsyncpa [#allocation4], 0 }
   0x3   :  { %16 = vsyncpa [#allocation4 + $0x1], 0  ;;  %s4844_s24 = smov 0   ;;  %s4846_s25 = smov 0  }
   0x4   :  { %s4848_s26 = smov 0   ;;  %s4850_s27 = smov 0  }
   0x5 LB: > { %s4865_s28 = sadd.s32 4294967295, %s4796_s27   ;;  %s3376_s29 = sadd.s32 4294967294, %s4796_s27   ;;  %s4796_s27 = sphi %s4850_s27, %s5487_s27   ;;  %s4792_s26 = sphi %s4848_s26, %s5486_s26   ;;  %s4788_s25 = sphi %s4846_s25, %s5485_s25   ;;  %s4784_s24 = sphi %s4844_s24, %s5484_s24  }
   0x6   : > { %s4869_s30 = sadd.s32 1, %s4796_s27   ;;  %s181_s8 = sadd.s32 1, %s4792_s26 }
   0x7   : > { %s178_s9 = ssub.s32 %s4796_s27, %s4869_s30  ;;  %p191_p0 = scmp.ne.s32.totalorder %s4792_s26, %s4788_s25 }
   0x8   : > { %p179_p1 = scmp.eq.s32.totalorder %s178_s9, 0  ;;  %p192_p2 = scmp.eq.s32.totalorder %s4865_s28, 3 }
   0x9   : > { %p197_p3 = scmp.ne.s32.totalorder %s4788_s25, %s4784_s24  ;;  %p198_p4 = scmp.eq.s32.totalorder %s3376_s29, 3 }
   0xa   : > { %s4880_s10 = scalar_select %p179_p1, %s4792_s26, %s181_s8  }
   0xb   : > { %p4882_p5 = por %p192_p2, %p191_p0  ;;  %p4886_p6 = por %p198_p4, %p197_p3 }
   0xc   : > { %p3377_p7 = scmp.ge.s32.totalorder %s4796_s27, 1  ;;  %p205_p8 = scmp.lt.s32.totalorder %s4796_s27, 5 }
   0xd   : > { %p4620_p9 = scmp.eq.s32.totalorder %s4865_s28, 0  ;;  %s216_s16 = sshll.u32 %s5474_s1, 4  ;;  %s217_s16 = int_to_ptr.hbm [resolvable:$true] %s216_s16 }
   0xe   : > { %p4893_p10 = pnand %p3377_p7, %p205_p8  ;;  %s4798_s17 = smov [#allocation2]  }
   0xf   : > { %s218_s18 = sshll.u32 %s4798_s17, 4  ;;  %s239_s21 = sshll.u32 %s5478_s5, 4  ;;  %s219_s18 = int_to_ptr.vmem [resolvable:$true] %s218_s18  ;;  %s240_s21 = int_to_ptr.hbm [resolvable:$true] %s239_s21 }
  0x10   : > { %p4609_p11 = pneg %p4893_p10  ;;  %s4799_s22 = smov 64  }
  0x11   : > { %s4800_s23 = smov 4   ;;  %s4801_s29 = smov [#allocation5]  }
  0x12   : > { %p4610_p12 = pnand %p4620_p9, %p4609_p11  ;;  %s241_s8 = sshll.u32 %s4801_s29, 4  ;;  %s242_s8 = int_to_ptr.vmem [resolvable:$true] %s241_s8 }
  0x13   : > { %270 = sbr.rel (%p4893_p10) target bundleno = 709 (0x2c5), region = 48 }
  0x14   : > { %4612 = dma.hbm_to_vmem [thread:$0]  (!%p4610_p12), %s217_s16, 6272, %s219_s18, [#allocation3], %s4799_s22, %s4799_s22, %s4800_s23  }
  0x15   : > { %4615 = dma.hbm_to_vmem [thread:$0]  (!%p4610_p12), %s240_s21, 10240, %s242_s8, [#allocation6], %s4799_s22, %s4799_s22, %s4800_s23  }
  0x18   : > { %4771 = dma.done.wait (%p4620_p9), [#allocation3], 6272  }
  0x19   : > { %4773 = vsyncadd (%p4620_p9), [#allocation3], 4294961024 }
  0x1a   : > { %4775 = dma.done.wait (%p4620_p9), [#allocation6], 10240  }
  0x1b   : > { %4777 = vsyncadd (%p4620_p9), [#allocation6], 4294957056  ;;  %v4387_v0 = vld [vmem:[#allocation2 + $0x38] sm:$0xff]  ;;  %v4386_v4 = vld [vmem:[#allocation2 + $0x30] sm:$0xff]  ;;  %s3385_s9 = sshll.u32 %s4865_s28, 2  ;;  %vm800_vm0 = vcmask 130048  }
  0x1c   : > { %v4395_v1 = vld [vmem:[#allocation2 + $0x78] sm:$0xff]  ;;  %807 = vmatpush.bf16.msra.mxu0 %v4387_v0  ;;  %v4394_v5 = vld [vmem:[#allocation2 + $0x70] sm:$0xff]  ;;  %v4385_v8 = vld [vmem:[#allocation2 + $0x28] sm:$0xff]  ;;  %p310_p13 = scmp.lt.s32.totalorder %s3385_s9, 15  ;;  %s306_s15 = sand.u32 1, %s4788_s25  }
  0x1d   : > { %v4403_v2 = vld [vmem:[#allocation2 + $0xb8] sm:$0xff]  ;;  %826 = vmatpush.bf16.msra.mxu1 %v4395_v1  ;;  %v4402_v6 = vld [vmem:[#allocation2 + $0xb0] sm:$0xff]  ;;  %v4393_v9 = vld [vmem:[#allocation2 + $0x68] sm:$0xff]  ;;  %s4589_s18 = sshll.u32 %s4865_s28, 5  ;;  %s3277_s28 = scalar_lea.sflag [#allocation4], %s306_s15 }
  0x1e   : > { %v4411_v3 = vld [vmem:[#allocation2 + $0xf8] sm:$0xff]  ;;  %845 = vmatpush.bf16.msra.mxu2 %v4403_v2  ;;  %v4410_v7 = vld [vmem:[#allocation2 + $0xf0] sm:$0xff]  ;;  %v4401_v10 = vld [vmem:[#allocation2 + $0xa8] sm:$0xff]  ;;  %s5489_s9 = smov (!%p310_p13, %s3385_s9), 15  ;;  %s3288_s21 = scalar_lea.hbm %s5480_s7, %s4589_s18 }
  0x1f   : > { %864 = vmatpush.bf16.msra.mxu3 %v4411_v3  ;;  %v4409_v11 = vld [vmem:[#allocation2 + $0xe8] sm:$0xff]  ;;  %v4384_v12 = vld [vmem:[#allocation2 + $0x20] sm:$0xff]  ;;  %v4383_v16 = vld [vmem:[#allocation2 + $0x18] sm:$0xff]  ;;  %s4598_s13 = smul.u32 28, %s5489_s9  ;;  %s3291_s23 = sshll.u32 %s3288_s21, 4  ;;  %s3292_s23 = int_to_ptr.hbm [resolvable:$true] %s3291_s23 }
  0x20   : > { %808 = vmatpush.bf16.msra.mxu0 %v4386_v4  ;;  %v4392_v13 = vld [vmem:[#allocation2 + $0x60] sm:$0xff]  ;;  %v4391_v17 = vld [vmem:[#allocation2 + $0x58] sm:$0xff]  ;;  %v4382_v20 = vld [vmem:[#allocation2 + $0x10] sm:$0xff]  ;;  %s4740_s29 = sshra.s32 %s3292_s23, 4  ;;  %s4746_s14 = scalar_lea.hbm %s5480_s7, 128  ;;  %s4741_s29 = int_to_ptr.hbm [resolvable:$true] %s4740_s29 }
  0x21   : > { %827 = vmatpush.bf16.msra.mxu1 %v4394_v5  ;;  %v4400_v14 = vld [vmem:[#allocation2 + $0xa0] sm:$0xff]  ;;  %v4399_v18 = vld [vmem:[#allocation2 + $0x98] sm:$0xff]  ;;  %v4390_v21 = vld [vmem:[#allocation2 + $0x50] sm:$0xff]  ;;  %s4921_s16 = scalar_lea.vmem %s5473_s0, %s4598_s13  ;;  %s4742_s8 = scalar_lea.hbm %s4741_s29, 32 }
  0x22   : > { %846 = vmatpush.bf16.msra.mxu2 %v4402_v6  ;;  %v4408_v15 = vld [vmem:[#allocation2 + $0xe0] sm:$0xff]  ;;  %v4407_v19 = vld [vmem:[#allocation2 + $0xd8] sm:$0xff]  ;;  %v4398_v22 = vld [vmem:[#allocation2 + $0x90] sm:$0xff]  ;;  %p4743_p0 = scmp.ne.s32.totalorder %s4741_s29, %s4742_s8  ;;  %p4747_p3 = scmp.lt.s32.totalorder %s4741_s29, %s5480_s7 }
  0x23   : > { %865 = vmatpush.bf16.msra.mxu3 %v4410_v7  ;;  %v4406_v23 = vld [vmem:[#allocation2 + $0xd0] sm:$0xff]  ;;  %v4381_v24 = vld [vmem:[#allocation2 + $0x8] sm:$0xff]  ;;  %v4380_v28 = vld [vmem:[#allocation2] sm:$0xff]  ;;  %p4748_p4 = scmp.lt.s32.totalorder %s4746_s14, %s4742_s8 }
  0x24   : > { %809 = vmatpush.bf16.msra.mxu0 %v4385_v8  ;;  %v4389_v25 = vld [vmem:[#allocation2 + $0x48] sm:$0xff]  ;;  %v4388_v29 = vld [vmem:[#allocation2 + $0x40] sm:$0xff]  ;;  %v4369_v33 = vld [vmem:[%s4921_s16 + $0x18] sm:$0xf0]  ;;  %p4744_p1 = pnand %p4743_p0, %p4882_p5 }
  0x25   : > { %828 = vmatpush.bf16.msra.mxu1 %v4393_v9  ;;  %v4397_v26 = vld [vmem:[#allocation2 + $0x88] sm:$0xff]  ;;  %v4396_v30 = vld [vmem:[#allocation2 + $0x80] sm:$0xff]  ;;  %v4419_v39 = vld [vmem:[#allocation2 + $0x138] sm:$0xff]  ;;  %p4749_p7 = por %p4748_p4, %p4747_p3 }
  0x26   : > { %847 = vmatpush.bf16.msra.mxu2 %v4401_v10  ;;  %v4405_v27 = vld [vmem:[#allocation2 + $0xc8] sm:$0xff]  ;;  %v4404_v31 = vld [vmem:[#allocation2 + $0xc0] sm:$0xff]  ;;  %v4427_v45 = vld [vmem:[#allocation2 + $0x178] sm:$0xff]  ;;  %p4745_p2 = pneg %p4744_p1 }
  0x27   : > { %866 = vmatpush.bf16.msra.mxu3 %v4409_v11  ;;  %v3389_v32 = vld [vmem:[%s4921_s16] sm:$0xf]  ;;  %v4366_v34 = vld [vmem:[%s4921_s16 + $0x4] sm:$0xf]  ;;  %v3397_v36 = vld [vmem:[%s4921_s16 + $0x8] sm:$0xf] }
  0x28   : > { %810 = vmatpush.bf16.msra.mxu0 %v4384_v12  ;;  %v3391_v35 = vld [vmem:[%s4921_s16 + $0x1c] sm:$0xf0]  ;;  %v4370_v37 = vld [vmem:[%s4921_s16 + $0x20] sm:$0xf0]  ;;  %v4367_v40 = vld [vmem:[%s4921_s16 + $0xc] sm:$0xf]  ;;  %v3390_v42 = vor.u32 %v4369_v33, %v3389_v32  ;;  %p4750_p8 = pnand %p4749_p7, %p4745_p2 }
  0x29   : > { %829 = vmatpush.bf16.msra.mxu1 %v4392_v13  ;;  %v4428_v38 = vld [vmem:[#allocation2 + $0x180] sm:$0xff]  ;;  %v3399_v41 = vld [vmem:[%s4921_s16 + $0x24] sm:$0xf0]  ;;  %v3394_v43 = vor.u32 %v4366_v34, %v3391_v35  ;;  %v3398_v44 = vor.u32 %v4370_v37, %v3397_v36  ;;  %v4418_v47 = vld [vmem:[#allocation2 + $0x130] sm:$0xff] }
  0x2a   : > { %848 = vmatpush.bf16.msra.mxu2 %v4400_v14  ;;  %v3402_v46 = vor.u32 %v4367_v40, %v3399_v41  ;;  %v4426_v48 = vld [vmem:[#allocation2 + $0x170] sm:$0xff]  ;;  %v4417_v49 = vld [vmem:[#allocation2 + $0x128] sm:$0xff]  ;;  %v4416_v51 = vld [vmem:[#allocation2 + $0x120] sm:$0xff] }
  0x2b   : > { %867 = vmatpush.bf16.msra.mxu3 %v4408_v15  ;;  %v4425_v50 = vld [vmem:[#allocation2 + $0x168] sm:$0xff]  ;;  %v4424_v52 = vld [vmem:[#allocation2 + $0x160] sm:$0xff]  ;;  %v3417_v53 = vld [vmem:[%s4921_s16 + $0x38] sm:$0xf] }
  0x2c   : > { %811 = vmatpush.bf16.msra.mxu0 %v4383_v16  ;;  %v4376_v54 = vld [vmem:[%s4921_s16 + $0x50] sm:$0xf0]  ;;  %v4373_v55 = vld [vmem:[%s4921_s16 + $0x3c] sm:$0xf]  ;;  %v3419_v56 = vld [vmem:[%s4921_s16 + $0x54] sm:$0xf0] }
  0x2d   : > { %830 = vmatpush.bf16.msra.mxu1 %v4391_v17  ;;  %v3425_v57 = vld [vmem:[%s4921_s16 + $0x40] sm:$0xf]  ;;  %v4377_v58 = vld [vmem:[%s4921_s16 + $0x58] sm:$0xf0]  ;;  %v4374_v60 = vld [vmem:[%s4921_s16 + $0x44] sm:$0xf]  ;;  %v3418_v62 = vor.u32 %v4376_v54, %v3417_v53  ;;  %v3422_v63 = vor.u32 %v4373_v55, %v3419_v56 }
  0x2e   : > { %849 = vmatpush.bf16.msra.mxu2 %v4399_v18  ;;  %v4415_v59 = vld [vmem:[#allocation2 + $0x118] sm:$0xff]  ;;  %v3427_v61 = vld [vmem:[%s4921_s16 + $0x5c] sm:$0xf0]  ;;  %v3426_v0 = vor.u32 %v4377_v58, %v3425_v57  ;;  %v4414_v3 = vld [vmem:[#allocation2 + $0x110] sm:$0xff] }
  0x2f   : > { %868 = vmatpush.bf16.msra.mxu3 %v4407_v19  ;;  %v4423_v1 = vld [vmem:[#allocation2 + $0x158] sm:$0xff]  ;;  %v3430_v2 = vor.u32 %v4374_v60, %v3427_v61  ;;  %v4422_v4 = vld [vmem:[#allocation2 + $0x150] sm:$0xff]  ;;  %v4413_v5 = vld [vmem:[#allocation2 + $0x108] sm:$0xff] }
  0x30   : > { %812 = vmatpush.bf16.msra.mxu0 %v4382_v20  ;;  %v4421_v6 = vld [vmem:[#allocation2 + $0x148] sm:$0xff]  ;;  %v4412_v7 = vld [vmem:[#allocation2 + $0x100] sm:$0xff]  ;;  %v3405_v9 = vld [vmem:[%s4921_s16 + $0x10] sm:$0xf] }
  0x31   : > { %831 = vmatpush.bf16.msra.mxu1 %v4390_v21  ;;  %v4420_v8 = vld [vmem:[#allocation2 + $0x140] sm:$0xff]  ;;  %v4371_v10 = vld [vmem:[%s4921_s16 + $0x28] sm:$0xf0]  ;;  %v4368_v11 = vld [vmem:[%s4921_s16 + $0x14] sm:$0xf] }
  0x32   : > { %850 = vmatpush.bf16.msra.mxu2 %v4398_v22  ;;  %v3407_v12 = vld [vmem:[%s4921_s16 + $0x2c] sm:$0xf0]  ;;  %v3413_v13 = vld [vmem:[%s4921_s16 + $0x18] sm:$0xf]  ;;  %v4372_v14 = vld [vmem:[%s4921_s16 + $0x30] sm:$0xf0]  ;;  %v3406_v15 = vor.u32 %v4371_v10, %v3405_v9 }
  0x33   : > { %869 = vmatpush.bf16.msra.mxu3 %v4406_v23  ;;  %v3410_v16 = vor.u32 %v4368_v11, %v3407_v12  ;;  %v3414_v17 = vor.u32 %v4372_v14, %v3413_v13  ;;  %v3433_v18 = vld [vmem:[%s4921_s16 + $0x48] sm:$0xf]  ;;  %v4378_v19 = vld [vmem:[%s4921_s16 + $0x60] sm:$0xf0]  ;;  %v4375_v20 = vld [vmem:[%s4921_s16 + $0x4c] sm:$0xf] }
  0x34   : > { %813 = vmatpush.bf16.msra.mxu0 %v4381_v24  ;;  %v3435_v21 = vld [vmem:[%s4921_s16 + $0x64] sm:$0xf0]  ;;  %v3441_v22 = vld [vmem:[%s4921_s16 + $0x50] sm:$0xf]  ;;  %v4379_v23 = vld [vmem:[%s4921_s16 + $0x68] sm:$0xf0]  ;;  %v3434_v24 = vor.u32 %v4378_v19, %v3433_v18 }
  0x35   : > { %832 = vmatpush.bf16.msra.mxu1 %v4389_v25  ;;  %v3438_v25 = vor.u32 %v4375_v20, %v3435_v21  ;;  %v4460_v32 = vld [vmem:[%s5476_s3 + $0xf8] sm:$0xff]  ;;  %v4435_v36 = vld [vmem:[%s5476_s3 + $0x30] sm:$0xff]  ;;  %v4434_v40 = vld [vmem:[%s5476_s3 + $0x28] sm:$0xff]  ;;  %s3384_s16 = sshll.u32 %s306_s15, 5 }
  0x36   : > { %851 = vmatpush.bf16.msra.mxu2 %v4397_v26  ;;  %v3442_v26 = vor.u32 %v4379_v23, %v3441_v22  ;;  %v4443_v37 = vld [vmem:[%s5476_s3 + $0x70] sm:$0xff]  ;;  %v4442_v41 = vld [vmem:[%s5476_s3 + $0x68] sm:$0xff]  ;;  %v4432_v54 = vld [vmem:[%s5476_s3 + $0x18] sm:$0xff]  ;;  %s5433_s17 = scalar_lea.vmem [#allocation7], %s3384_s16 }
  0x37   : > { %870 = vmatpush.bf16.msra.mxu3 %v4405_v27  ;;  %v4440_v55 = vld [vmem:[%s5476_s3 + $0x58] sm:$0xff]  ;;  %v4429_v13 = vld [vmem:[%s5476_s3] sm:$0xff]  ;;  %s3289_s22 = sshll.u32 %s5433_s17, 4  ;;  %s3290_s22 = int_to_ptr.vmem [resolvable:$true] %s3289_s22 }
  0x38   : > { %814 = vmatpush.bf16.msra.mxu0 %v4380_v28  ;;  %v4448_v56 = vld [vmem:[%s5476_s3 + $0x98] sm:$0xff]  ;;  %v4437_v14 = vld [vmem:[%s5476_s3 + $0x40] sm:$0xff] }
  0x39   : > { %833 = vmatpush.bf16.msra.mxu1 %v4388_v29  ;;  %v4436_v29 = vld [vmem:[%s5476_s3 + $0x38] sm:$0xff]  ;;  %v4453_v18 = vld [vmem:[%s5476_s3 + $0xc0] sm:$0xff] }
  0x3a   : > { %852 = vmatpush.bf16.msra.mxu2 %v4396_v30  ;;  %v4444_v30 = vld [vmem:[%s5476_s3 + $0x78] sm:$0xff] }
  0x3b   : > { %871 = vmatpush.bf16.msra.mxu3 %v4404_v31  ;;  %815 = vmatmul.bf16.vlgmr.msra.gmra.mxu0 %v3390_v42  ;;  %v4452_v31 = vld [vmem:[%s5476_s3 + $0xb8] sm:$0xff]  ;;  %v4450_v42 = vld [vmem:[%s5476_s3 + $0xa8] sm:$0xff] }
  0x3c   : > { %883 = vmatpush.bf16.msrb.mxu0 %v4419_v39  ;;  %834 = vmatmul.bf16.vlgmr.msra.gmra.mxu1 %v3394_v43  ;;  %v4459_v39 = vld [vmem:[%s5476_s3 + $0xf0] sm:$0xff]  ;;  %v4458_v43 = vld [vmem:[%s5476_s3 + $0xe8] sm:$0xff]  ;;  %v4456_v57 = vld [vmem:[%s5476_s3 + $0xd8] sm:$0xff] }
  0x3d   : > { %853 = vmatmul.bf16.vlgmr.msra.gmra.mxu2 %v3398_v44  ;;  %902 = vmatpush.bf16.msrb.mxu1 %v4427_v45  ;;  %v4992_v45 = vld [vmem:[%s5475_s2] ss:$0 sm:$0xff] }
  0x3e   : > { %928 = vmatpush.bf16.msrb.mxu2 %v4428_v38  ;;  %872 = vmatmul.bf16.vlgmr.msra.gmra.mxu3 %v3402_v46  ;;  %v4451_v38 = vld [vmem:[%s5476_s3 + $0xb0] sm:$0xff] }
  0x3f   : > { %1916 = vmatpush.bf16.msrb.mxu3 %v4436_v29 }
  0x40   : > { %884 = vmatpush.bf16.msrb.mxu0 %v4418_v47 }
  0x41   : > { %903 = vmatpush.bf16.msrb.mxu1 %v4426_v48  ;;  %v4433_v48 = vld [vmem:[%s5476_s3 + $0x20] sm:$0xff] }
  0x42   : > { %1973 = vmatpush.bf16.msra.mxu2 %v4460_v32  ;;  %v4476_v32 = vld [vmem:[%s5476_s3 + $0x178] sm:$0xff] }
  0x43   : > { %1917 = vmatpush.bf16.msrb.mxu3 %v4435_v36  ;;  %v4492_v36 = vld [vmem:[%s5476_s3 + $0x1f8] sm:$0xff] }
  0x44   : > { %885 = vmatpush.bf16.msrb.mxu0 %v4417_v49  ;;  %v4441_v49 = vld [vmem:[%s5476_s3 + $0x60] sm:$0xff] }
  0x45   : > { %904 = vmatpush.bf16.msrb.mxu1 %v4425_v50  ;;  %v4449_v50 = vld [vmem:[%s5476_s3 + $0xa0] sm:$0xff] }
  0x46   : > { %1974 = vmatpush.bf16.msra.mxu2 %v4459_v39  ;;  %v4475_v39 = vld [vmem:[%s5476_s3 + $0x170] sm:$0xff] }
  0x47   : > { %1918 = vmatpush.bf16.msrb.mxu3 %v4434_v40  ;;  %v4483_v40 = vld [vmem:[%s5476_s3 + $0x1b0] sm:$0xff] }
  0x48   : > { %886 = vmatpush.bf16.msrb.mxu0 %v4416_v51  ;;  %v4457_v51 = vld [vmem:[%s5476_s3 + $0xe0] sm:$0xff] }
  0x49   : > { %905 = vmatpush.bf16.msrb.mxu1 %v4424_v52 }
  0x4a   : > { %1975 = vmatpush.bf16.msra.mxu2 %v4458_v43 }
  0x4b   : > { %820 = vmatmul.bf16.gmra.mxu0 %v3418_v62  ;;  %1919 = vmatpush.bf16.msrb.mxu3 %v4433_v48  ;;  %v4431_v62 = vld [vmem:[%s5476_s3 + $0x10] sm:$0xff] }
  0x4c   : > { %887 = vmatpush.bf16.msrb.mxu0 %v4415_v59  ;;  %839 = vmatmul.bf16.gmra.mxu1 %v3422_v63  ;;  %v4439_v63 = vld [vmem:[%s5476_s3 + $0x50] sm:$0xff] }
  0x4d   : > { %858 = vmatmul.bf16.gmra.mxu2 %v3426_v0  ;;  %906 = vmatpush.bf16.msrb.mxu1 %v4423_v1  ;;  %v4447_v0 = vld [vmem:[%s5476_s3 + $0x90] sm:$0xff] }
  0x4e   : > { %877 = vmatmul.bf16.gmra.mxu3 %v3430_v2  ;;  %1976 = vmatpush.bf16.msra.mxu2 %v4457_v51  ;;  %v4455_v1 = vld [vmem:[%s5476_s3 + $0xd0] sm:$0xff] }
  0x4f   : > { %1920 = vmatpush.bf16.msrb.mxu3 %v4432_v54 }
  0x50   : > { %888 = vmatpush.bf16.msrb.mxu0 %v4414_v3  ;;  %v4430_v3 = vld [vmem:[%s5476_s3 + $0x8] sm:$0xff] }
  0x51   : > { %907 = vmatpush.bf16.msrb.mxu1 %v4422_v4  ;;  %v4438_v4 = vld [vmem:[%s5476_s3 + $0x48] sm:$0xff] }
  0x52   : > { %1977 = vmatpush.bf16.msra.mxu2 %v4456_v57  ;;  %v4490_v57 = vld [vmem:[%s5476_s3 + $0x1e8] sm:$0xff] }
  0x53   : > { %1921 = vmatpush.bf16.msrb.mxu3 %v4431_v62 }
  0x54   : > { %889 = vmatpush.bf16.msrb.mxu0 %v4413_v5  ;;  %v4446_v5 = vld [vmem:[%s5476_s3 + $0x88] sm:$0xff] }
  0x55   : > { %908 = vmatpush.bf16.msrb.mxu1 %v4421_v6 }
  0x56   : > { %1978 = vmatpush.bf16.msra.mxu2 %v4455_v1 }
  0x57   : > { %1922 = vmatpush.bf16.msrb.mxu3 %v4430_v3 }
  0x58   : > { %890 = vmatpush.bf16.msrb.mxu0 %v4412_v7  ;;  %v4454_v7 = vld [vmem:[%s5476_s3 + $0xc8] sm:$0xff] }
  0x59   : > { %909 = vmatpush.bf16.msrb.mxu1 %v4420_v8 }
  0x5a   : > { %1979 = vmatpush.bf16.msra.mxu2 %v4454_v7  ;;  %v4473_v7 = vld [vmem:[%s5476_s3 + $0x160] sm:$0xff] }
  0x5b   : > { %891 = vmatmul.bf16.vlgmr.msrb.gmra.mxu0 %v3406_v15  ;;  %v4445_v15 = vld [vmem:[%s5476_s3 + $0x80] sm:$0xff]  ;;  %1923 = vmatpush.bf16.msrb.mxu3 %v4429_v13 }
  0x5c   : > { %910 = vmatmul.bf16.vlgmr.msrb.gmra.mxu1 %v3410_v16  ;;  %1935 = vmatpush.bf16.msra.mxu0 %v4444_v30 }
  0x5d   : > { %3639 = vmatmul.msk.bf16.vlgmr.msrb.gmra.mxu2 %vm800_vm0, %v3414_v17  ;;  %1954 = vmatpush.bf16.msra.mxu1 %v4452_v31  ;;  %v4468_v31 = vld [vmem:[%s5476_s3 + $0x138] sm:$0xff] }
  0x5e   : > { %1980 = vmatpush.bf16.msra.mxu2 %v4453_v18 }
  0x5f   : > { %1992 = vmatpush.bf16.msra.mxu3 %v4468_v31 }
  0x60   : > { %1936 = vmatpush.bf16.msra.mxu0 %v4443_v37 }
  0x61   : > { %1955 = vmatpush.bf16.msra.mxu1 %v4451_v38  ;;  %v4467_v38 = vld [vmem:[%s5476_s3 + $0x130] sm:$0xff] }
  0x62   : > { %2049 = vmatpush.bf16.msrb.mxu2 %v4492_v36 }
  0x63   : > { %1993 = vmatpush.bf16.msra.mxu3 %v4467_v38 }
  0x64   : > { %1937 = vmatpush.bf16.msra.mxu0 %v4442_v41  ;;  %v4491_v41 = vld [vmem:[%s5476_s3 + $0x1f0] sm:$0xff] }
  0x65   : > { %1956 = vmatpush.bf16.msra.mxu1 %v4450_v42 }
  0x66   : > { %2050 = vmatpush.bf16.msrb.mxu2 %v4491_v41  ;;  %v4488_v41 = vld [vmem:[%s5476_s3 + $0x1d8] sm:$0xff] }
  0x68   : > { %1938 = vmatpush.bf16.msra.mxu0 %v4441_v49 }
  0x69   : > { %1957 = vmatpush.bf16.msra.mxu1 %v4449_v50 }
  0x6a   : > { %2051 = vmatpush.bf16.msrb.mxu2 %v4490_v57 }
  0x6b   : > { %896 = vmatmul.bf16.gmra.mxu0 %v3434_v24 }
  0x6c   : > { %915 = vmatmul.bf16.gmra.mxu1 %v3438_v25  ;;  %1939 = vmatpush.bf16.msra.mxu0 %v4440_v55 }
  0x6d   : > { %3640 = vmatmul.msk.bf16.gmra.mxu2 %vm800_vm0, %v3442_v26  ;;  %1958 = vmatpush.bf16.msra.mxu1 %v4448_v56  ;;  %v4482_v56 = vld [vmem:[%s5476_s3 + $0x1a8] sm:$0xff] }
  0x70   : > { %1940 = vmatpush.bf16.msra.mxu0 %v4439_v63 }
  0x71   : > { %1959 = vmatpush.bf16.msra.mxu1 %v4447_v0 }
  0x74   : > { %1941 = vmatpush.bf16.msra.mxu0 %v4438_v4 }
  0x75   : > { %1960 = vmatpush.bf16.msra.mxu1 %v4446_v5 }
  0x78   : > { %1942 = vmatpush.bf16.msra.mxu0 %v4437_v14 }
  0x79   : > { %1961 = vmatpush.bf16.msra.mxu1 %v4445_v15 }
  0x7c   : > { %2011 = vmatpush.bf16.msrb.mxu0 %v4476_v32 }
  0x80   : > { %2012 = vmatpush.bf16.msrb.mxu0 %v4475_v39  ;;  %v4472_v39 = vld [vmem:[%s5476_s3 + $0x158] sm:$0xff] }
  0xb8   : > { %v816_v27 = vpop.f32.mrf.mxu0 }
  0xb9   : > { %v835_v28 = vpop.f32.mrf.mxu1  ;;  %v817_v52 = vadd.f32 %v4992_v45, %v816_v27 }
  0xbb   : > { %v836_v59 = vadd.f32 %v835_v28, %v817_v52  ;;  %v4466_v52 = vld [vmem:[%s5476_s3 + $0x128] sm:$0xff] }
  0xbc   : > { %1994 = vmatpush.bf16.msra.mxu3 %v4466_v52  ;;  %v4471_v52 = vld [vmem:[%s5476_s3 + $0x150] sm:$0xff] }
  0xc0   : > { %v854_v33 = vpop.f32.mrf.mxu2  ;;  %v818_v34 = vpop.f32.mrf.mxu0 }
  0xc1   : > { %v4963_v35 = vpop.f32.mrf.mxu1  ;;  %v873_v53 = vpop.f32.mrf.mxu3  ;;  %v855_v2 = vadd.f32 %v854_v33, %v836_v59  ;;  %v819_v6 = vadd.f32 %v4992_v45, %v818_v34  ;;  %v4484_v33 = vld [vmem:[%s5476_s3 + $0x1b8] sm:$0xff] }
  0xc2   : > { %2030 = vmatpush.bf16.msrb.mxu1 %v4484_v33 }
  0xc3   : > { %v874_v10 = vadd.f32 %v873_v53, %v855_v2  ;;  %v838_v16 = vadd.f32 %v4963_v35, %v819_v6  ;;  %v4474_v53 = vld [vmem:[%s5476_s3 + $0x168] sm:$0xff]  ;;  %v4465_v6 = vld [vmem:[%s5476_s3 + $0x120] sm:$0xff] }
  0xc4   : > { %2013 = vmatpush.bf16.msrb.mxu0 %v4474_v53  ;;  %1995 = vmatpush.bf16.msra.mxu3 %v4465_v6  ;;  %v4479_v53 = vld [vmem:[%s5476_s3 + $0x190] sm:$0xff] }
  0xc6   : > { %2031 = vmatpush.bf16.msrb.mxu1 %v4483_v40  ;;  %v4480_v40 = vld [vmem:[%s5476_s3 + $0x198] sm:$0xff] }
  0xc8   : > { %v856_v44 = vpop.f32.mrf.mxu2  ;;  %v821_v46 = vpop.f32.mrf.mxu0  ;;  %2014 = vmatpush.bf16.msrb.mxu0 %v4473_v7 }
  0xc9   : > { %v840_v47 = vpop.f32.mrf.mxu1  ;;  %v875_v8 = vpop.f32.mrf.mxu3  ;;  %v822_v19 = vadd.f32 %v4992_v45, %v821_v46  ;;  %v857_v20 = vadd.f32 %v856_v44, %v838_v16 }
  0xca   : > { %2032 = vmatpush.bf16.msrb.mxu1 %v4482_v56 }
  0xcb   : > { %v841_v22 = vadd.f32 %v840_v47, %v822_v19  ;;  %v876_v24 = vadd.f32 %v875_v8, %v857_v20 }
  0xcc   : > { %2015 = vmatpush.bf16.msrb.mxu0 %v4472_v39 }
  0xd0   : > { %v859_v58 = vpop.f32.mrf.mxu2  ;;  %v823_v60 = vpop.f32.mrf.mxu0  ;;  %2016 = vmatpush.bf16.msrb.mxu0 %v4471_v52 }
  0xd1   : > { %v5019_v61 = vpop.f32.mrf.mxu1  ;;  %v878_v28 = vpop.f32.mrf.mxu3  ;;  %v860_v34 = vadd.f32 %v859_v58, %v841_v22  ;;  %v824_v35 = vadd.f32 %v4992_v45, %v823_v60 }
  0xd3   : > { %v843_v44 = vadd.f32 %v5019_v61, %v824_v35  ;;  %v879_v45 = vadd.f32 %v878_v28, %v860_v34  ;;  %v4464_v34 = vld [vmem:[%s5476_s3 + $0x118] sm:$0xff] }
  0xd4   : > { %1996 = vmatpush.bf16.msra.mxu3 %v4464_v34 }
  0xd8   : > { %v861_v9 = vpop.f32.mrf.mxu2  ;;  %v892_v11 = vpop.f32.mrf.mxu0 }
  0xd9   : > { %v911_v12 = vpop.f32.mrf.mxu1  ;;  %v893_v17 = vadd.f32 %v892_v11, %v874_v10  ;;  %v862_v54 = vadd.f32 %v861_v9, %v843_v44  ;;  %v880_v0 = vpop.f32.mrf.mxu3  ;;  %v4481_v10 = vld [vmem:[%s5476_s3 + $0x1a0] sm:$0xff] }
  0xda   : > { %v4489_v11 = vld [vmem:[%s5476_s3 + $0x1e0] sm:$0xff]  ;;  %2033 = vmatpush.bf16.msrb.mxu1 %v4481_v10 }
  0xdb   : > { %v912_v21 = vadd.f32 %v911_v12, %v893_v17  ;;  %v881_v13 = vadd.f32 %v880_v0, %v862_v54  ;;  %2052 = vmatpush.bf16.msrb.mxu2 %v4489_v11  ;;  %v4470_v11 = vld [vmem:[%s5476_s3 + $0x148] sm:$0xff] }
  0xdc   : > { %2017 = vmatpush.bf16.msrb.mxu0 %v4470_v11 }
  0xde   : > { %2034 = vmatpush.bf16.msrb.mxu1 %v4480_v40 }
  0xdf   : > { %2053 = vmatpush.bf16.msrb.mxu2 %v4488_v41 }
  0xe0   : > { %v930_v23 = vpop.f32.mrf.mxu2  ;;  %v894_v26 = vpop.f32.mrf.mxu0 }
  0xe1   : > { %v931_v25 = vadd.f32 %v930_v23, %v912_v21  ;;  %v913_v27 = vpop.f32.mrf.mxu1  ;;  %v895_v30 = vadd.f32 %v894_v26, %v876_v24 }
  0xe2   : > { %2035 = vmatpush.bf16.msrb.mxu1 %v4479_v53 }
  0xe3   : > { %v940_v29 = vmax.f32 %v931_v25, 0.0  ;;  %v914_v43 = vadd.f32 %v913_v27, %v895_v30 }
  0xe5   : > { %v944_v37 = vmin.f32 %v940_v29, 1.0 }
  0xe7   : > { %v5085_v42 = vmul.f32 4.5, %v944_v37 }
  0xe8   : > { %v932_v46 = vpop.f32.mrf.mxu2  ;;  %v897_v48 = vpop.f32.mrf.mxu0 }
  0xe9   : > { %v933_v47 = vadd.f32 %v932_v46, %v914_v43  ;;  %v3641_v49 = vadd.f32 4.5, %v5085_v42  ;;  %v3645_v50 = vadd.f32 3.5, %v5085_v42  ;;  %v3649_v51 = vadd.f32 2.5, %v5085_v42  ;;  %v916_v61 = vpop.f32.mrf.mxu1 }
  0xea   : > { %v3653_v55 = vadd.f32 1.5, %v5085_v42  ;;  %v3657_v58 = vadd.f32 0.5, %v5085_v42  ;;  %v898_v60 = vadd.f32 %v897_v48, %v879_v45  ;;  %v5112_v8 = vadd.f32 -0.5, %v5085_v42  ;;  %v4463_v48 = vld [vmem:[%s5476_s3 + $0x110] sm:$0xff] }
  0xeb   : > { %v941_v59 = vmax.f32 %v933_v47, 0.0  ;;  %v956_v62 = vand.u32 2147483647, %v3641_v49  ;;  %v976_v63 = vand.u32 2147483647, %v3645_v50  ;;  %v5123_v21 = vadd.f32 -1.5, %v5085_v42  ;;  %1997 = vmatpush.bf16.msra.mxu3 %v4463_v48 }
  0xec   : > { %v996_v1 = vand.u32 2147483647, %v3649_v51  ;;  %v1016_v2 = vand.u32 2147483647, %v3653_v55  ;;  %v1036_v12 = vand.u32 2147483647, %v3657_v58  ;;  %v917_v15 = vadd.f32 %v916_v61, %v898_v60 }
  0xed   : > { %v945_v3 = vmin.f32 %v941_v59, 1.0  ;;  %v960_v4 = vsub.f32 1.0, %v956_v62  ;;  %v980_v5 = vsub.f32 1.0, %v976_v63  ;;  %v1056_v26 = vand.u32 2147483647, %v5112_v8  ;;  %v4487_v59 = vld [vmem:[%s5476_s3 + $0x1d0] sm:$0xff] }
  0xee   : > { %v1000_v9 = vsub.f32 1.0, %v996_v1  ;;  %v1020_v20 = vsub.f32 1.0, %v1016_v2  ;;  %v5131_v30 = vsub.f32 1.0, %v1036_v12  ;;  %v1076_v54 = vand.u32 2147483647, %v5123_v21  ;;  %v4478_v12 = vld [vmem:[%s5476_s3 + $0x188] sm:$0xff]  ;;  %2054 = vmatpush.bf16.msrb.mxu2 %v4487_v59 }
  0xef   : > { %v5120_v14 = vmul.f32 4.5, %v945_v3  ;;  %v964_v16 = vmax.f32 %v960_v4, 0.0  ;;  %v984_v18 = vmax.f32 %v980_v5, 0.0  ;;  %v4462_v5 = vld [vmem:[%s5476_s3 + $0x108] sm:$0xff]  ;;  %2036 = vmatpush.bf16.msrb.mxu1 %v4478_v12  ;;  %v5190_v40 = vsub.f32 1.0, %v1056_v26 }
  0xf0   : > { %v935_v17 = vpop.f32.mrf.mxu2  ;;  %v1004_v19 = vmax.f32 %v1000_v9, 0.0  ;;  %v899_v23 = vpop.f32.mrf.mxu0  ;;  %v1024_v38 = vmax.f32 %v1020_v20, 0.0  ;;  %1998 = vmatpush.bf16.msra.mxu3 %v4462_v5  ;;  %v4506_v21 = vld [vmem:[%s5476_s3 + $0x268] sm:$0xff] }
  0xf1   : > { %v936_v22 = vadd.f32 %v935_v17, %v917_v15  ;;  %v3642_v24 = vadd.f32 4.5, %v5120_v14  ;;  %v3646_v25 = vadd.f32 3.5, %v5120_v14  ;;  %v900_v27 = vadd.f32 %v899_v23, %v881_v13  ;;  %v918_v44 = vpop.f32.mrf.mxu1 }
  0xf2   : > { %v5128_v28 = vpack.c.bf16 %v964_v16, %v964_v16  ;;  %v3650_v29 = vadd.f32 2.5, %v5120_v14  ;;  %v988_v35 = vpack.c.bf16 %v984_v18, %v984_v18  ;;  %v1008_v37 = vpack.c.bf16 %v1004_v19, %v1004_v19  ;;  %v4486_v18 = vld [vmem:[%s5476_s3 + $0x1c8] sm:$0xff] }
  0xf3   : > { %v942_v31 = vmax.f32 %v936_v22, 0.0  ;;  %v957_v32 = vand.u32 2147483647, %v3642_v24  ;;  %v977_v33 = vand.u32 2147483647, %v3646_v25  ;;  %v3654_v47 = vadd.f32 1.5, %v5120_v14  ;;  %2055 = vmatpush.bf16.msrb.mxu2 %v4486_v18 }
  0xf4   : > { %v997_v36 = vand.u32 2147483647, %v3650_v29  ;;  %v919_v49 = vadd.f32 %v918_v44, %v900_v27  ;;  %v1156_v50 = vunpack.c.l.b16 %v5128_v28  ;;  %v1168_v61 = vunpack.c.l.b16 %v988_v35  ;;  %v4461_v29 = vld [vmem:[%s5476_s3 + $0x100] sm:$0xff] }
  0xf5   : > { %v946_v43 = vmin.f32 %v942_v31, 1.0  ;;  %v961_v45 = vsub.f32 1.0, %v957_v32  ;;  %v981_v46 = vsub.f32 1.0, %v977_v33  ;;  %v1017_v58 = vand.u32 2147483647, %v3654_v47  ;;  %v4469_v35 = vld [vmem:[%s5476_s3 + $0x140] sm:$0xff]  ;;  %1999 = vmatpush.bf16.msra.mxu3 %v4461_v29 }
  0xf6   : > { %v1001_v51 = vsub.f32 1.0, %v997_v36  ;;  %v1180_v63 = vunpack.c.l.b16 %v1008_v37  ;;  %v1028_v0 = vpack.c.bf16 %v1024_v38, %v1024_v38  ;;  %v4477_v36 = vld [vmem:[%s5476_s3 + $0x180] sm:$0xff]  ;;  %2018 = vmatpush.bf16.msrb.mxu0 %v4469_v35  ;;  %v3662_v52 = vadd.f32 -0.5, %v5120_v14  ;;  %v4498_v29 = vld [vmem:[%s5476_s3 + $0x228] sm:$0xff] }
  0xf7   : > { %v5157_v55 = vmul.f32 4.5, %v946_v43  ;;  %v965_v56 = vmax.f32 %v961_v45, 0.0  ;;  %v985_v57 = vmax.f32 %v981_v46, 0.0  ;;  %v1021_v4 = vsub.f32 1.0, %v1017_v58  ;;  %v4485_v44 = vld [vmem:[%s5476_s3 + $0x1c0] sm:$0xff]  ;;  %2037 = vmatpush.bf16.msrb.mxu1 %v4477_v36 }
  0xf8   : > { %v937_v60 = vpop.f32.mrf.mxu2  ;;  %v1005_v62 = vmax.f32 %v1001_v51, 0.0  ;;  %v1192_v38 = vunpack.c.l.b16 %v1028_v0  ;;  %v3658_v45 = vadd.f32 0.5, %v5120_v14  ;;  %v1044_v46 = vmax.f32 %v5131_v30, 0.0  ;;  %2056 = vmatpush.bf16.msrb.mxu2 %v4485_v44 }
  0xf9   : > { %v938_v1 = vadd.f32 %v937_v60, %v919_v49  ;;  %v969_v2 = vpack.c.bf16 %v965_v56, %v965_v56  ;;  %v989_v3 = vpack.c.bf16 %v985_v57, %v985_v57  ;;  %v3643_v7 = vadd.f32 4.5, %v5157_v55 }
  0xfa   : > { %v1009_v6 = vpack.c.bf16 %v1005_v62, %v1005_v62  ;;  %v3647_v9 = vadd.f32 3.5, %v5157_v55  ;;  %v3651_v10 = vadd.f32 2.5, %v5157_v55  ;;  %v1025_v17 = vmax.f32 %v1021_v4, 0.0  ;;  %v4508_v62 = vld [vmem:[%s5476_s3 + $0x278] sm:$0xff] }
  0xfb   : > { %v943_v13 = vmax.f32 %v938_v1, 0.0  ;;  %v1157_v15 = vunpack.c.l.b16 %v969_v2  ;;  %v1169_v16 = vunpack.c.l.b16 %v989_v3  ;;  %v958_v20 = vand.u32 2147483647, %v3643_v7  ;;  %v4499_v7 = vld [vmem:[%s5476_s3 + $0x230] sm:$0xff] }
  0xfc   : > { %v1181_v19 = vunpack.c.l.b16 %v1009_v6  ;;  %v978_v22 = vand.u32 2147483647, %v3647_v9  ;;  %v998_v23 = vand.u32 2147483647, %v3651_v10  ;;  %v1029_v28 = vpack.c.bf16 %v1025_v17, %v1025_v17  ;;  %v4507_v9 = vld [vmem:[%s5476_s3 + $0x270] sm:$0xff] }
  0xfd   : > { %v947_v24 = vmin.f32 %v943_v13, 1.0  ;;  %v1160_v25 = vpack.c.b16 %v1157_v15, %v1156_v50  ;;  %v1172_v27 = vpack.c.b16 %v1169_v16, %v1168_v61  ;;  %v962_v32 = vsub.f32 1.0, %v958_v20  ;;  %v4500_v61 = vld [vmem:[%s5476_s3 + $0x238] sm:$0xff] }
  0xfe   : > { %v1184_v31 = vpack.c.b16 %v1181_v19, %v1180_v63  ;;  %v982_v33 = vsub.f32 1.0, %v978_v22  ;;  %v1002_v34 = vsub.f32 1.0, %v998_v23  ;;  %v1193_v39 = vunpack.c.l.b16 %v1029_v28 }
  0xff   : > { %v5186_v37 = vmul.f32 4.5, %v947_v24  ;;  %1924 = vmatmul.bf16.vlgmr.msrb.gmra.mxu3 %v1160_v25  ;;  %1943 = vmatmul.bf16.vlgmr.msra.gmra.mxu0 %v1172_v27  ;;  %v966_v41 = vmax.f32 %v962_v32, 0.0  ;;  %v3655_v43 = vadd.f32 1.5, %v5157_v55  ;;  %v1037_v60 = vand.u32 2147483647, %v3658_v45 }
 0x100   : > { %1962 = vmatmul.bf16.vlgmr.msra.gmra.mxu1 %v1184_v31  ;;  %v1196_v47 = vpack.c.b16 %v1193_v39, %v1192_v38  ;;  %v986_v49 = vmax.f32 %v982_v33, 0.0  ;;  %v1006_v50 = vmax.f32 %v1002_v34, 0.0  ;;  %v1057_v6 = vand.u32 2147483647, %v3662_v52  ;;  %2068 = vmatpush.bf16.msrb.mxu3 %v4500_v61 }
 0x101   : > { %v3644_v48 = vadd.f32 4.5, %v5186_v37  ;;  %v3648_v8 = vadd.f32 3.5, %v5186_v37  ;;  %v3652_v26 = vadd.f32 2.5, %v5186_v37  ;;  %v3656_v51 = vadd.f32 1.5, %v5186_v37  ;;  %2087 = vmatpush.bf16.msra.mxu0 %v4508_v62 }
 0x102   : > { %1981 = vmatmul.bf16.vlgmr.msra.gmra.mxu2 %v1196_v47  ;;  %v970_v58 = vpack.c.bf16 %v966_v41, %v966_v41  ;;  %v1018_v59 = vand.u32 2147483647, %v3655_v43  ;;  %v990_v3 = vpack.c.bf16 %v986_v49, %v986_v49  ;;  %v1010_v4 = vpack.c.bf16 %v1006_v50, %v1006_v50 }
 0x103   : > { %v959_v53 = vand.u32 2147483647, %v3644_v48  ;;  %v979_v56 = vand.u32 2147483647, %v3648_v8  ;;  %v999_v57 = vand.u32 2147483647, %v3652_v26  ;;  %v1048_v45 = vpack.c.bf16 %v1044_v46, %v1044_v46 }
 0x104   : > { %v1019_v2 = vand.u32 2147483647, %v3656_v51  ;;  %v1022_v5 = vsub.f32 1.0, %v1018_v59  ;;  %v1158_v15 = vunpack.c.l.b16 %v970_v58  ;;  %v1041_v17 = vsub.f32 1.0, %v1037_v60  ;;  %2069 = vmatpush.bf16.msrb.mxu3 %v4499_v7  ;;  %v4505_v26 = vld [vmem:[%s5476_s3 + $0x260] sm:$0xff] }
 0x105   : > { %v963_v63 = vsub.f32 1.0, %v959_v53  ;;  %v983_v0 = vsub.f32 1.0, %v979_v56  ;;  %v1003_v1 = vsub.f32 1.0, %v999_v57  ;;  %v5217_v18 = vsub.f32 1.0, %v1076_v54  ;;  %2088 = vmatpush.bf16.msra.mxu0 %v4507_v9 }
 0x106   : > { %v1023_v13 = vsub.f32 1.0, %v1019_v2  ;;  %v1026_v16 = vmax.f32 %v1022_v5, 0.0  ;;  %v1170_v24 = vunpack.c.l.b16 %v990_v3  ;;  %v1182_v25 = vunpack.c.l.b16 %v1010_v4  ;;  %v4496_v5 = vld [vmem:[%s5476_s3 + $0x218] sm:$0xff] }
 0x107   : > { %v967_v10 = vmax.f32 %v963_v63, 0.0  ;;  %v987_v11 = vmax.f32 %v983_v0, 0.0  ;;  %v1007_v12 = vmax.f32 %v1003_v1, 0.0  ;;  %v1061_v28 = vsub.f32 1.0, %v1057_v6  ;;  %v4504_v6 = vld [vmem:[%s5476_s3 + $0x258] sm:$0xff] }
 0x108   : > { %v1027_v23 = vmax.f32 %v1023_v13, 0.0  ;;  %v1030_v27 = vpack.c.bf16 %v1026_v16, %v1026_v16  ;;  %v1045_v35 = vmax.f32 %v1041_v17, 0.0  ;;  %v1064_v36 = vmax.f32 %v5190_v40, 0.0  ;;  %2070 = vmatpush.bf16.msrb.mxu3 %v4498_v29  ;;  %v4497_v40 = vld [vmem:[%s5476_s3 + $0x220] sm:$0xff] }
 0x109   : > { %v971_v19 = vpack.c.bf16 %v967_v10, %v967_v10  ;;  %v991_v20 = vpack.c.bf16 %v987_v11, %v987_v11  ;;  %v1011_v22 = vpack.c.bf16 %v1007_v12, %v1007_v12  ;;  %v3666_v38 = vadd.f32 -1.5, %v5120_v14  ;;  %2089 = vmatpush.bf16.msra.mxu0 %v4506_v21 }
 0x10a   : > { %v1031_v33 = vpack.c.bf16 %v1027_v23, %v1027_v23  ;;  %v1194_v34 = vunpack.c.l.b16 %v1030_v27  ;;  %v1065_v47 = vmax.f32 %v1061_v28, 0.0  ;;  %v3669_v8 = vadd.f32 -2.5, %v5085_v42 }
 0x10b   : > { %v1159_v54 = vunpack.c.l.b16 %v971_v19  ;;  %v1171_v31 = vunpack.c.l.b16 %v991_v20  ;;  %v1183_v32 = vunpack.c.l.b16 %v1011_v22  ;;  %v1077_v48 = vand.u32 2147483647, %v3666_v38  ;;  %v4495_v20 = vld [vmem:[%s5476_s3 + $0x210] sm:$0xff] }
 0x10c   : > { %v1195_v44 = vunpack.c.l.b16 %v1031_v33  ;;  %v3670_v30 = vadd.f32 -2.5, %v5120_v14  ;;  %v3659_v46 = vadd.f32 0.5, %v5157_v55  ;;  %v3660_v50 = vadd.f32 0.5, %v5186_v37  ;;  %2071 = vmatpush.bf16.msrb.mxu3 %v4497_v40  ;;  %v4503_v22 = vld [vmem:[%s5476_s3 + $0x250] sm:$0xff] }
 0x10d   : > { %v1161_v39 = vpack.c.b16 %v1159_v54, %v1158_v15  ;;  %v1173_v41 = vpack.c.b16 %v1171_v31, %v1170_v24  ;;  %v1185_v43 = vpack.c.b16 %v1183_v32, %v1182_v25  ;;  %v1049_v51 = vpack.c.bf16 %v1045_v35, %v1045_v35  ;;  %2090 = vmatpush.bf16.msra.mxu0 %v4505_v26 }
 0x10e   : > { %v1197_v49 = vpack.c.b16 %v1195_v44, %v1194_v34  ;;  %v1081_v52 = vsub.f32 1.0, %v1077_v48  ;;  %v1084_v53 = vmax.f32 %v5217_v18, 0.0  ;;  %v1096_v56 = vand.u32 2147483647, %v3669_v8 }
 0x10f   : > { %1929 = vmatmul.bf16.gmra.mxu3 %v1161_v39  ;;  %1948 = vmatmul.bf16.gmra.mxu0 %v1173_v41  ;;  %v1068_v57 = vpack.c.bf16 %v1064_v36, %v1064_v36  ;;  %v1097_v58 = vand.u32 2147483647, %v3670_v30  ;;  %v1038_v59 = vand.u32 2147483647, %v3659_v46  ;;  %v1039_v60 = vand.u32 2147483647, %v3660_v50 }
 0x110   : > { %1967 = vmatmul.bf16.gmra.mxu1 %v1185_v43  ;;  %v1069_v61 = vpack.c.bf16 %v1065_v47, %v1065_v47  ;;  %v1085_v62 = vmax.f32 %v1081_v52, 0.0  ;;  %v1100_v63 = vsub.f32 1.0, %v1096_v56  ;;  %v3663_v0 = vadd.f32 -0.5, %v5157_v55  ;;  %2072 = vmatpush.bf16.msrb.mxu3 %v4496_v5  ;;  %v4494_v39 = vld [vmem:[%s5476_s3 + $0x208] sm:$0xff]  ;;  %v4493_v56 = vld [vmem:[%s5476_s3 + $0x200] sm:$0xff] }
 0x111   : > { %v1101_v1 = vsub.f32 1.0, %v1097_v58  ;;  %v1042_v2 = vsub.f32 1.0, %v1038_v59  ;;  %v1043_v3 = vsub.f32 1.0, %v1039_v60  ;;  %v3664_v4 = vadd.f32 -0.5, %v5186_v37  ;;  %2091 = vmatpush.bf16.msra.mxu0 %v4504_v6  ;;  %v4502_v41 = vld [vmem:[%s5476_s3 + $0x248] sm:$0xff] }
 0x112   : > { %1986 = vmatmul.bf16.gmra.mxu2 %v1197_v49  ;;  %v1205_v7 = vunpack.c.l.b16 %v1049_v51  ;;  %v1088_v9 = vpack.c.bf16 %v1084_v53, %v1084_v53  ;;  %v1089_v10 = vpack.c.bf16 %v1085_v62, %v1085_v62  ;;  %v3667_v11 = vadd.f32 -1.5, %v5157_v55 }
 0x113   : > { %v1104_v12 = vmax.f32 %v1100_v63, 0.0  ;;  %v1105_v13 = vmax.f32 %v1101_v1, 0.0  ;;  %v1058_v15 = vand.u32 2147483647, %v3663_v0  ;;  %v1059_v16 = vand.u32 2147483647, %v3664_v4 }
 0x114   : > { %v1204_v17 = vunpack.c.l.b16 %v1048_v45  ;;  %v1046_v18 = vmax.f32 %v1042_v2, 0.0  ;;  %v3668_v19 = vadd.f32 -1.5, %v5186_v37  ;;  %v1217_v23 = vunpack.c.l.b16 %v1069_v61  ;;  %2073 = vmatpush.bf16.msrb.mxu3 %v4495_v20 }
 0x115   : > { %v1229_v24 = vunpack.c.l.b16 %v1089_v10  ;;  %v1047_v25 = vmax.f32 %v1043_v3, 0.0  ;;  %v1063_v27 = vsub.f32 1.0, %v1059_v16  ;;  %v1216_v28 = vunpack.c.l.b16 %v1068_v57  ;;  %2092 = vmatpush.bf16.msra.mxu0 %v4503_v22  ;;  %v4501_v57 = vld [vmem:[%s5476_s3 + $0x240] sm:$0xff] }
 0x116   : > { %v1109_v29 = vpack.c.bf16 %v1105_v13, %v1105_v13  ;;  %v1078_v21 = vand.u32 2147483647, %v3667_v11  ;;  %v1208_v54 = vpack.c.b16 %v1205_v7, %v1204_v17  ;;  %v1228_v31 = vunpack.c.l.b16 %v1088_v9 }
 0x117   : > { %v1108_v32 = vpack.c.bf16 %v1104_v12, %v1104_v12  ;;  %v1062_v33 = vsub.f32 1.0, %v1058_v15  ;;  %v5257_v34 = vpack.c.bf16 %v1046_v18, %v1046_v18  ;;  %v1067_v35 = vmax.f32 %v1063_v27, 0.0 }
 0x118   : > { %v1079_v36 = vand.u32 2147483647, %v3668_v19  ;;  %v3671_v38 = vadd.f32 -2.5, %v5157_v55  ;;  %v1220_v43 = vpack.c.b16 %v1217_v23, %v1216_v28  ;;  %v1232_v44 = vpack.c.b16 %v1229_v24, %v1228_v31  ;;  %2074 = vmatpush.bf16.msrb.mxu3 %v4494_v39 }
 0x119   : > { %v5266_v45 = vpack.c.bf16 %v1047_v25, %v1047_v25  ;;  %v3672_v47 = vadd.f32 -2.5, %v5186_v37  ;;  %v1241_v48 = vunpack.c.l.b16 %v1109_v29  ;;  %v1082_v8 = vsub.f32 1.0, %v1078_v21  ;;  %2093 = vmatpush.bf16.msra.mxu0 %v4502_v41 }
 0x11a   : > { %v1083_v40 = vsub.f32 1.0, %v1079_v36  ;;  %v1098_v26 = vand.u32 2147483647, %v3671_v38  ;;  %v1240_v49 = vunpack.c.l.b16 %v1108_v32  ;;  %v3673_v46 = vadd.f32 -3.5, %v5085_v42 }
 0x11b   : > { %v1099_v30 = vand.u32 2147483647, %v3672_v47  ;;  %v3674_v50 = vadd.f32 -3.5, %v5120_v14  ;;  %v1206_v51 = vunpack.c.l.b16 %v5257_v34  ;;  %v1066_v52 = vmax.f32 %v1062_v33, 0.0 }
 0x11c   : > { %v5272_v53 = vpack.c.bf16 %v1067_v35, %v1067_v35  ;;  %v3677_v58 = vadd.f32 -4.5, %v5085_v42  ;;  %v1207_v59 = vunpack.c.l.b16 %v5266_v45  ;;  %v1087_v60 = vmax.f32 %v1083_v40, 0.0  ;;  %2075 = vmatpush.bf16.msrb.mxu3 %v4493_v56 }
 0x11d   : > { %v1116_v61 = vand.u32 2147483647, %v3673_v46  ;;  %v1117_v62 = vand.u32 2147483647, %v3674_v50  ;;  %v1244_v63 = vpack.c.b16 %v1241_v48, %v1240_v49  ;;  %v1086_v0 = vmax.f32 %v1082_v8, 0.0  ;;  %2094 = vmatpush.bf16.msra.mxu0 %v4501_v57 }
 0x11e   : > { %v1102_v1 = vsub.f32 1.0, %v1098_v26  ;;  %v3678_v2 = vadd.f32 -4.5, %v5120_v14  ;;  %v1103_v3 = vsub.f32 1.0, %v1099_v30  ;;  %v1136_v6 = vand.u32 2147483647, %v3677_v58 }
 0x11f   : > { %2000 = vmatmul.bf16.vlgmr.msra.gmra.mxu3 %v1208_v54  ;;  %2019 = vmatmul.bf16.vlgmr.msrb.gmra.mxu0 %v1220_v43  ;;  %v1120_v4 = vsub.f32 1.0, %v1116_v61  ;;  %v1121_v5 = vsub.f32 1.0, %v1117_v62  ;;  %v1070_v7 = vpack.c.bf16 %v1066_v52, %v1066_v52  ;;  %v1219_v42 = vunpack.c.l.b16 %v5272_v53 }
 0x120   : > { %2038 = vmatmul.bf16.vlgmr.msrb.gmra.mxu1 %v1232_v44  ;;  %v1137_v9 = vand.u32 2147483647, %v3678_v2  ;;  %v3675_v10 = vadd.f32 -3.5, %v5157_v55  ;;  %v1091_v11 = vpack.c.bf16 %v1087_v60, %v1087_v60  ;;  %v1140_v15 = vsub.f32 1.0, %v1136_v6 }
 0x121   : > { %v1124_v12 = vmax.f32 %v1120_v4, 0.0  ;;  %v1125_v13 = vmax.f32 %v1121_v5, 0.0  ;;  %v1090_v16 = vpack.c.bf16 %v1086_v0, %v1086_v0  ;;  %v1106_v17 = vmax.f32 %v1102_v1, 0.0 }
 0x122   : > { %2057 = vmatmul.bf16.vlgmr.msrb.gmra.mxu2 %v1244_v63  ;;  %v1141_v14 = vsub.f32 1.0, %v1137_v9  ;;  %v3676_v18 = vadd.f32 -3.5, %v5186_v37  ;;  %v1107_v19 = vmax.f32 %v1103_v3, 0.0  ;;  %v1144_v23 = vmax.f32 %v1140_v15, 0.0 }
 0x123   : > { %v1128_v20 = vpack.c.bf16 %v1124_v12, %v1124_v12  ;;  %v1129_v22 = vpack.c.bf16 %v1125_v13, %v1125_v13  ;;  %v1118_v25 = vand.u32 2147483647, %v3675_v10  ;;  %v3679_v28 = vadd.f32 -4.5, %v5157_v55 }
 0x124   : > { %v1145_v24 = vmax.f32 %v1141_v14, 0.0  ;;  %v1119_v27 = vand.u32 2147483647, %v3676_v18  ;;  %v1231_v29 = vunpack.c.l.b16 %v1091_v11  ;;  %v1148_v31 = vpack.c.bf16 %v1144_v23, %v1144_v23  ;;  %v5299_v18 = vld [vmem:[%s5477_s4] ss:$0 sm:$0xff] }
 0x125   : > { %v1252_v21 = vunpack.c.l.b16 %v1128_v20  ;;  %v1253_v54 = vunpack.c.l.b16 %v1129_v22  ;;  %v1122_v33 = vsub.f32 1.0, %v1118_v25  ;;  %v3680_v36 = vadd.f32 -4.5, %v5186_v37 }
 0x126   : > { %v1149_v32 = vpack.c.bf16 %v1145_v24, %v1145_v24  ;;  %v1123_v35 = vsub.f32 1.0, %v1119_v27  ;;  %v1111_v38 = vpack.c.bf16 %v1107_v19, %v1107_v19  ;;  %v1264_v41 = vunpack.c.l.b16 %v1148_v31  ;;  %v4524_v27 = vld [vmem:[#allocation5 + $0x78] sm:$0xff]  ;;  %v4523_v31 = vld [vmem:[#allocation5 + $0x70] sm:$0xff] }
 0x127   : > { %v1256_v39 = vpack.c.b16 %v1253_v54, %v1252_v21  ;;  %v1138_v43 = vand.u32 2147483647, %v3679_v28  ;;  %v1126_v45 = vmax.f32 %v1122_v33, 0.0  ;;  %v1139_v48 = vand.u32 2147483647, %v3680_v36  ;;  %v4516_v28 = vld [vmem:[#allocation5 + $0x38] sm:$0xff]  ;;  %3101 = vmatpush.bf16.msra.mxu2 %v4524_v27 }
 0x128   : > { %v1265_v44 = vunpack.c.l.b16 %v1149_v32  ;;  %v1127_v47 = vmax.f32 %v1123_v35, 0.0  ;;  %v1218_v8 = vunpack.c.l.b16 %v1070_v7  ;;  %v1230_v40 = vunpack.c.l.b16 %v1090_v16  ;;  %v4540_v54 = vld [vmem:[#allocation5 + $0xf8] sm:$0xff]  ;;  %3082 = vmatpush.bf16.msra.mxu1 %v4516_v28  ;;  %v4515_v32 = vld [vmem:[#allocation5 + $0x30] sm:$0xff]  ;;  %v4509_v28 = vld [vmem:[#allocation5] sm:$0xff] }
 0x129   : > { %v1110_v55 = vpack.c.bf16 %v1106_v17, %v1106_v17  ;;  %v1142_v26 = vsub.f32 1.0, %v1138_v43  ;;  %v1130_v30 = vpack.c.bf16 %v1126_v45, %v1126_v45  ;;  %v1143_v50 = vsub.f32 1.0, %v1139_v48  ;;  %3139 = vmatpush.bf16.msrb.mxu0 %v4540_v54  ;;  %v4531_v33 = vld [vmem:[#allocation5 + $0xb0] sm:$0xff]  ;;  %v4522_v45 = vld [vmem:[#allocation5 + $0x68] sm:$0xff] }
 0x12a   : > { %v1268_v49 = vpack.c.b16 %v1265_v44, %v1264_v41  ;;  %v1131_v46 = vpack.c.bf16 %v1127_v47, %v1127_v47  ;;  %v1209_v52 = vpack.c.b16 %v1207_v59, %v1206_v51  ;;  %v1221_v37 = vpack.c.b16 %v1219_v42, %v1218_v8  ;;  %v4539_v35 = vld [vmem:[#allocation5 + $0xf0] sm:$0xff]  ;;  %v4514_v47 = vld [vmem:[#allocation5 + $0x28] sm:$0xff] }
 0x12b   : > { %v1243_v53 = vunpack.c.l.b16 %v1111_v38  ;;  %v1146_v56 = vmax.f32 %v1142_v26, 0.0  ;;  %v1233_v57 = vpack.c.b16 %v1231_v29, %v1230_v40  ;;  %v1254_v58 = vunpack.c.l.b16 %v1130_v30  ;;  %v4532_v29 = vld [vmem:[#allocation5 + $0xb8] sm:$0xff]  ;;  %3102 = vmatpush.bf16.msra.mxu2 %v4523_v31  ;;  %v4530_v48 = vld [vmem:[#allocation5 + $0xa8] sm:$0xff]  ;;  %v4513_v30 = vld [vmem:[#allocation5 + $0x20] sm:$0xff] }
 0x12c   : > { %v1255_v60 = vunpack.c.l.b16 %v1131_v46  ;;  %v1147_v61 = vmax.f32 %v1143_v50, 0.0  ;;  %v1242_v62 = vunpack.c.l.b16 %v1110_v55  ;;  %3120 = vmatpush.bf16.msra.mxu3 %v4532_v29  ;;  %3083 = vmatpush.bf16.msra.mxu1 %v4515_v32  ;;  %v4538_v40 = vld [vmem:[#allocation5 + $0xe8] sm:$0xff]  ;;  %v4529_v50 = vld [vmem:[#allocation5 + $0xa0] sm:$0xff]  ;;  %v4556_v31 = vld [vmem:[#allocation5 + $0x178] sm:$0xff] }
 0x12d   : > { %v1150_v63 = vpack.c.bf16 %v1146_v56, %v1146_v56  ;;  %3140 = vmatpush.bf16.msrb.mxu0 %v4539_v35  ;;  %v4533_v29 = vld [vmem:[#allocation5 + $0xc0] sm:$0xff]  ;;  %v4548_v32 = vld [vmem:[#allocation5 + $0x138] sm:$0xff] }
 0x12e   : > { %v1257_v0 = vpack.c.b16 %v1255_v60, %v1254_v58  ;;  %v1151_v1 = vpack.c.bf16 %v1147_v61, %v1147_v61  ;;  %v1245_v2 = vpack.c.b16 %v1243_v53, %v1242_v62  ;;  %v4520_v61 = vld [vmem:[#allocation5 + $0x58] sm:$0xff] }
 0x12f   : > { %2005 = vmatmul.bf16.gmra.mxu3 %v1209_v52  ;;  %2024 = vmatmul.bf16.gmra.mxu0 %v1221_v37  ;;  %v1266_v3 = vunpack.c.l.b16 %v1150_v63  ;;  %v4537_v52 = vld [vmem:[#allocation5 + $0xe0] sm:$0xff]  ;;  %v4512_v62 = vld [vmem:[#allocation5 + $0x18] sm:$0xff] }
 0x130   : > { %2043 = vmatmul.bf16.gmra.mxu1 %v1233_v57  ;;  %v1267_v4 = vunpack.c.l.b16 %v1151_v1  ;;  %3121 = vmatpush.bf16.msra.mxu3 %v4531_v33  ;;  %v4528_v63 = vld [vmem:[#allocation5 + $0x98] sm:$0xff] }
 0x131   : > { %3103 = vmatpush.bf16.msra.mxu2 %v4522_v45  ;;  %3084 = vmatpush.bf16.msra.mxu1 %v4514_v47 }
 0x132   : > { %2062 = vmatmul.bf16.gmra.mxu2 %v1245_v2  ;;  %v1269_v34 = vpack.c.b16 %v1267_v4, %v1266_v3  ;;  %3141 = vmatpush.bf16.msrb.mxu0 %v4538_v40  ;;  %v4519_v3 = vld [vmem:[#allocation5 + $0x50] sm:$0xff] }
 0x133   : > { %v4511_v4 = vld [vmem:[#allocation5 + $0x10] sm:$0xff] }
 0x134   : > { %3122 = vmatpush.bf16.msra.mxu3 %v4530_v48  ;;  %v4547_v40 = vld [vmem:[#allocation5 + $0x130] sm:$0xff] }
 0x135   : > { %3085 = vmatpush.bf16.msra.mxu1 %v4513_v30  ;;  %v5336_v30 = vld [vmem:[#allocation5 + $0x1f0] sm:$0xff] }
 0x136   : > { %3142 = vmatpush.bf16.msrb.mxu0 %v4537_v52 }
 0x138   : > { %3123 = vmatpush.bf16.msra.mxu3 %v4529_v50 }
 0x139   : > { %3086 = vmatpush.bf16.msra.mxu1 %v4512_v62 }
 0x13c   : > { %3124 = vmatpush.bf16.msra.mxu3 %v4528_v63 }
 0x13d   : > { %3087 = vmatpush.bf16.msra.mxu1 %v4511_v4 }
 0x13f   : > { %2076 = vmatmul.bf16.vlgmr.msrb.gmra.mxu3 %v1256_v39  ;;  %2095 = vmatmul.bf16.vlgmr.msra.gmra.mxu0 %v1268_v49  ;;  %v4521_v49 = vld [vmem:[#allocation5 + $0x60] sm:$0xff] }
 0x140   : > { %3104 = vmatpush.bf16.msra.mxu2 %v4521_v49  ;;  %v4563_v49 = vld [vmem:[#allocation5 + $0x1b0] sm:$0xff] }
 0x144   : > { %3105 = vmatpush.bf16.msra.mxu2 %v4520_v61  ;;  %v4546_v61 = vld [vmem:[#allocation5 + $0x128] sm:$0xff] }
 0x148   : > { %3106 = vmatpush.bf16.msra.mxu2 %v4519_v3 }
 0x14f   : > { %2081 = vmatmul.bf16.gmra.mxu3 %v1257_v0  ;;  %2100 = vmatmul.bf16.gmra.mxu0 %v1269_v34  ;;  %v4536_v0 = vld [vmem:[#allocation5 + $0xd8] sm:$0xff] }
 0x150   : > { %3143 = vmatpush.bf16.msrb.mxu0 %v4536_v0 }
 0x17c   : > { %v1944_v51 = vpop.f32.mrf.mxu0 }
 0x17d   : > { %v1963_v42 = vpop.f32.mrf.mxu1 }
 0x182   : > { %v1925_v59 = vpop.f32.mrf.mxu3 }
 0x183   : > { %v1926_v22 = vadd.f32 %v5299_v18, %v1925_v59 }
 0x184   : > { %v1946_v5 = vpop.f32.mrf.mxu0 }
 0x185   : > { %v1982_v9 = vpop.f32.mrf.mxu2  ;;  %v1965_v12 = vpop.f32.mrf.mxu1  ;;  %v1945_v24 = vadd.f32 %v1944_v51, %v1926_v22 }
 0x187   : > { %v1964_v36 = vadd.f32 %v1963_v42, %v1945_v24 }
 0x189   : > { %v1983_v43 = vadd.f32 %v1982_v9, %v1964_v36  ;;  %v4564_v36 = vld [vmem:[#allocation5 + $0x1b8] sm:$0xff] }
 0x18a   : > { %v1927_v6 = vpop.f32.mrf.mxu3 }
 0x18b   : > { %v1928_v38 = vadd.f32 %v5299_v18, %v1927_v6  ;;  %v4535_v6 = vld [vmem:[#allocation5 + $0xd0] sm:$0xff] }
 0x18c   : > { %v1949_v7 = vpop.f32.mrf.mxu0  ;;  %3144 = vmatpush.bf16.msrb.mxu0 %v4535_v6 }
 0x18d   : > { %v1984_v15 = vpop.f32.mrf.mxu2  ;;  %v5294_v17 = vpop.f32.mrf.mxu1  ;;  %v1947_v44 = vadd.f32 %v1946_v5, %v1928_v38  ;;  %v4527_v5 = vld [vmem:[#allocation5 + $0x90] sm:$0xff]  ;;  %v5329_v38 = vld [vmem:[#allocation5 + $0x1f8] sm:$0xff] }
 0x18e   : > { %3125 = vmatpush.bf16.msra.mxu3 %v4527_v5 }
 0x18f   : > { %v1966_v37 = vadd.f32 %v1965_v12, %v1947_v44 }
 0x191   : > { %v1985_v60 = vadd.f32 %v1984_v15, %v1966_v37 }
 0x192   : > { %v1930_v10 = vpop.f32.mrf.mxu3 }
 0x193   : > { %v1931_v46 = vadd.f32 %v5299_v18, %v1930_v10 }
 0x194   : > { %v5290_v11 = vpop.f32.mrf.mxu0 }
 0x195   : > { %v5303_v20 = vpop.f32.mrf.mxu2  ;;  %v5306_v25 = vpop.f32.mrf.mxu1  ;;  %v1950_v57 = vadd.f32 %v1949_v7, %v1931_v46 }
 0x197   : > { %v1969_v34 = vadd.f32 %v5294_v17, %v1950_v57  ;;  %v4518_v17 = vld [vmem:[#allocation5 + $0x48] sm:$0xff] }
 0x198   : > { %3107 = vmatpush.bf16.msra.mxu2 %v4518_v17 }
 0x199   : > { %v1988_v10 = vadd.f32 %v5303_v20, %v1969_v34 }
 0x19a   : > { %v5292_v13 = vpop.f32.mrf.mxu3 }
 0x19b   : > { %v1933_v51 = vadd.f32 %v5299_v18, %v5292_v13  ;;  %v4526_v18 = vld [vmem:[#allocation5 + $0x88] sm:$0xff] }
 0x19c   : > { %v2020_v16 = vpop.f32.mrf.mxu0  ;;  %3126 = vmatpush.bf16.msra.mxu3 %v4526_v18  ;;  %v4561_v18 = vld [vmem:[#allocation5 + $0x1a0] sm:$0xff] }
 0x19d   : > { %v5311_v39 = vpop.f32.mrf.mxu2  ;;  %v2039_v55 = vpop.f32.mrf.mxu1  ;;  %v1952_v12 = vadd.f32 %v5290_v11, %v1933_v51  ;;  %v4525_v11 = vld [vmem:[#allocation5 + $0x80] sm:$0xff] }
 0x19f   : > { %v1971_v20 = vadd.f32 %v5306_v25, %v1952_v12 }
 0x1a0   : > { %3127 = vmatpush.bf16.msra.mxu3 %v4525_v11 }
 0x1a1   : > { %v1990_v25 = vadd.f32 %v5311_v39, %v1971_v20 }
 0x1a2   : > { %v2001_v14 = vpop.f32.mrf.mxu3 }
 0x1a3   : > { %v2002_v26 = vadd.f32 %v2001_v14, %v1983_v43  ;;  %v4510_v14 = vld [vmem:[#allocation5 + $0x8] sm:$0xff] }
 0x1a4   : > { %v5301_v19 = vpop.f32.mrf.mxu0  ;;  %3088 = vmatpush.bf16.msra.mxu1 %v4510_v14  ;;  %3196 = vmatpush.bf16.msrb.mxu3 %v4564_v36  ;;  %v4544_v36 = vld [vmem:[#allocation5 + $0x118] sm:$0xff] }
 0x1a5   : > { %v2021_v53 = vadd.f32 %v2020_v16, %v2002_v26  ;;  %v2058_v56 = vpop.f32.mrf.mxu2  ;;  %v2041_v7 = vpop.f32.mrf.mxu1 }
 0x1a7   : > { %v2040_v1 = vadd.f32 %v2039_v55, %v2021_v53 }
 0x1a8   : > { %3089 = vmatpush.bf16.msra.mxu1 %v4509_v28  ;;  %3197 = vmatpush.bf16.msrb.mxu3 %v4563_v49 }
 0x1a9   : > { %v2059_v42 = vadd.f32 %v2058_v56, %v2040_v1  ;;  %v4554_v56 = vld [vmem:[#allocation5 + $0x168] sm:$0xff] }
 0x1aa   : > { %v2003_v23 = vpop.f32.mrf.mxu3  ;;  %v4562_v1 = vld [vmem:[#allocation5 + $0x1a8] sm:$0xff] }
 0x1ab   : > { %v2004_v2 = vadd.f32 %v2003_v23, %v1985_v60  ;;  %v4534_v23 = vld [vmem:[#allocation5 + $0xc8] sm:$0xff] }
 0x1ac   : > { %v5308_v21 = vpop.f32.mrf.mxu0  ;;  %3145 = vmatpush.bf16.msrb.mxu0 %v4534_v23  ;;  %3158 = vmatpush.bf16.msrb.mxu1 %v4548_v32 }
 0x1ad   : > { %v2023_v9 = vadd.f32 %v5301_v19, %v2004_v2  ;;  %v2060_v16 = vpop.f32.mrf.mxu2  ;;  %v4517_v19 = vld [vmem:[#allocation5 + $0x40] sm:$0xff]  ;;  %v2044_v43 = vpop.f32.mrf.mxu1  ;;  %v5344_v2 = vld [vmem:[#allocation5 + $0x1e8] sm:$0xff]  ;;  %3198 = vmatpush.bf16.msrb.mxu3 %v4562_v1  ;;  %v4559_v1 = vld [vmem:[#allocation5 + $0x190] sm:$0xff] }
 0x1ae   : > { %3108 = vmatpush.bf16.msra.mxu2 %v4517_v19 }
 0x1af   : > { %v2042_v24 = vadd.f32 %v2041_v7, %v2023_v9 }
 0x1b0   : > { %3146 = vmatpush.bf16.msrb.mxu0 %v4533_v29  ;;  %3159 = vmatpush.bf16.msrb.mxu1 %v4547_v40 }
 0x1b1   : > { %3199 = vmatpush.bf16.msrb.mxu3 %v4561_v18 }
 0x1b2   : > { %v5313_v41 = vpop.f32.mrf.mxu3  ;;  %3177 = vmatpush.bf16.msrb.mxu2 %v4556_v31 }
 0x1b3   : > { %v2007_v22 = vadd.f32 %v5313_v41, %v1988_v10  ;;  %v2061_v41 = vadd.f32 %v2060_v16, %v2042_v24  ;;  %v4545_v16 = vld [vmem:[#allocation5 + $0x120] sm:$0xff] }
 0x1b4   : > { %v5315_v8 = vpop.f32.mrf.mxu0  ;;  %3215 = vmatpush.bf16.msra.mxu0 %v5329_v38  ;;  %3160 = vmatpush.bf16.msrb.mxu1 %v4546_v61 }
 0x1b5   : > { %v2026_v33 = vadd.f32 %v5308_v21, %v2007_v22  ;;  %v4555_v21 = vld [vmem:[#allocation5 + $0x170] sm:$0xff]  ;;  %v2063_v39 = vpop.f32.mrf.mxu2  ;;  %v5349_v22 = vld [vmem:[#allocation5 + $0x1e0] sm:$0xff] }
 0x1b6   : > { %3178 = vmatpush.bf16.msrb.mxu2 %v4555_v21 }
 0x1b7   : > { %v2045_v55 = vadd.f32 %v2044_v43, %v2026_v33 }
 0x1b8   : > { %3216 = vmatpush.bf16.msra.mxu0 %v5336_v30  ;;  %3161 = vmatpush.bf16.msrb.mxu1 %v4545_v16 }
 0x1b9   : > { %v2064_v3 = vadd.f32 %v2063_v39, %v2045_v55 }
 0x1ba   : > { %v5318_v58 = vpop.f32.mrf.mxu3  ;;  %3179 = vmatpush.bf16.msrb.mxu2 %v4554_v56 }
 0x1bb   : > { %v2009_v26 = vadd.f32 %v5318_v58, %v1990_v25 }
 0x1bc   : > { %v2096_v59 = vpop.f32.mrf.mxu0  ;;  %3217 = vmatpush.bf16.msra.mxu0 %v5344_v2  ;;  %3162 = vmatpush.bf16.msrb.mxu1 %v4544_v36 }
 0x1bd   : > { %v2028_v62 = vadd.f32 %v5315_v8, %v2009_v26  ;;  %v2065_v31 = vpop.f32.mrf.mxu2 }
 0x1c0   : > { %3218 = vmatpush.bf16.msra.mxu0 %v5349_v22 }
 0x1c2   : > { %v2077_v15 = vpop.f32.mrf.mxu3 }
 0x1c3   : > { %v2078_v13 = vadd.f32 %v2077_v15, %v2059_v42  ;;  %v2046_v42 = vpop.f32.mrf.mxu1  ;;  %v4553_v15 = vld [vmem:[#allocation5 + $0x160] sm:$0xff] }
 0x1c4   : > { %v2098_v35 = vpop.f32.mrf.mxu0  ;;  %3180 = vmatpush.bf16.msrb.mxu2 %v4553_v15 }
 0x1c5   : > { %v2097_v27 = vadd.f32 %v2096_v59, %v2078_v13  ;;  %v2047_v13 = vadd.f32 %v2046_v42, %v2028_v62 }
 0x1c7   : > { %v2106_v54 = vmax.f32 %v2097_v27, 0.0 }
 0x1c9   : > { %v2110_v44 = vmin.f32 %v2106_v54, 1.0  ;;  %v4552_v54 = vld [vmem:[#allocation5 + $0x158] sm:$0xff] }
 0x1ca   : > { %v2079_v45 = vpop.f32.mrf.mxu3  ;;  %3181 = vmatpush.bf16.msrb.mxu2 %v4552_v54 }
 0x1cb   : > { %v5332_v47 = vmul.f32 4.5, %v2110_v44  ;;  %v2080_v48 = vadd.f32 %v2079_v45, %v2061_v41  ;;  %v2066_v41 = vadd.f32 %v2065_v31, %v2047_v13  ;;  %v4560_v45 = vld [vmem:[#allocation5 + $0x198] sm:$0xff] }
 0x1cc   : > { %v2101_v59 = vpop.f32.mrf.mxu0  ;;  %3200 = vmatpush.bf16.msrb.mxu3 %v4560_v45 }
 0x1cd   : > { %v2099_v46 = vadd.f32 %v2098_v35, %v2080_v48  ;;  %v4001_v50 = vadd.f32 4.5, %v5332_v47  ;;  %v4005_v52 = vadd.f32 3.5, %v5332_v47  ;;  %v4009_v37 = vadd.f32 2.5, %v5332_v47  ;;  %v5363_v48 = vld [vmem:[#allocation5 + $0x1d8] sm:$0xff] }
 0x1ce   : > { %v4013_v53 = vadd.f32 1.5, %v5332_v47  ;;  %3219 = vmatpush.bf16.msra.mxu0 %v5363_v48 }
 0x1cf   : > { %v2107_v57 = vmax.f32 %v2099_v46, 0.0  ;;  %v2122_v60 = vand.u32 2147483647, %v4001_v50  ;;  %v2142_v58 = vand.u32 2147483647, %v4005_v52 }
 0x1d0   : > { %v2162_v63 = vand.u32 2147483647, %v4009_v37  ;;  %v2182_v0 = vand.u32 2147483647, %v4013_v53  ;;  %3201 = vmatpush.bf16.msrb.mxu3 %v4559_v1 }
 0x1d1   : > { %v2111_v4 = vmin.f32 %v2107_v57, 1.0  ;;  %v2126_v34 = vsub.f32 1.0, %v2122_v60  ;;  %v2146_v51 = vsub.f32 1.0, %v2142_v58  ;;  %v4551_v60 = vld [vmem:[#allocation5 + $0x150] sm:$0xff] }
 0x1d2   : > { %v2082_v5 = vpop.f32.mrf.mxu3  ;;  %v2166_v6 = vsub.f32 1.0, %v2162_v63  ;;  %v2186_v7 = vsub.f32 1.0, %v2182_v0  ;;  %v4543_v58 = vld [vmem:[#allocation5 + $0x110] sm:$0xff]  ;;  %3182 = vmatpush.bf16.msrb.mxu2 %v4551_v60 }
 0x1d3   : > { %v5346_v9 = vmul.f32 4.5, %v2111_v4  ;;  %v2083_v8 = vadd.f32 %v2082_v5, %v2064_v3  ;;  %v2130_v10 = vmax.f32 %v2126_v34, 0.0  ;;  %v2150_v12 = vmax.f32 %v2146_v51, 0.0  ;;  %v5370_v3 = vld [vmem:[#allocation5 + $0x1d0] sm:$0xff]  ;;  %3163 = vmatpush.bf16.msrb.mxu1 %v4543_v58 }
 0x1d4   : > { %v2170_v17 = vmax.f32 %v2166_v6, 0.0  ;;  %v2190_v14 = vmax.f32 %v2186_v7, 0.0  ;;  %v2103_v61 = vpop.f32.mrf.mxu0  ;;  %3220 = vmatpush.bf16.msra.mxu0 %v5370_v3 }
 0x1d5   : > { %v2102_v23 = vadd.f32 %v2101_v59, %v2083_v8  ;;  %v4002_v24 = vadd.f32 4.5, %v5346_v9  ;;  %v5352_v27 = vpack.c.bf16 %v2130_v10, %v2130_v10  ;;  %v4006_v19 = vadd.f32 3.5, %v5346_v9 }
 0x1d6   : > { %v5355_v28 = vpack.c.bf16 %v2150_v12, %v2150_v12  ;;  %v4010_v20 = vadd.f32 2.5, %v5346_v9  ;;  %v5358_v11 = vpack.c.bf16 %v2170_v17, %v2170_v17  ;;  %v4014_v29 = vadd.f32 1.5, %v5346_v9 }
 0x1d7   : > { %v2108_v32 = vmax.f32 %v2102_v23, 0.0  ;;  %v2123_v33 = vand.u32 2147483647, %v4002_v24  ;;  %v2143_v35 = vand.u32 2147483647, %v4006_v19  ;;  %v2322_v43 = vunpack.c.l.b16 %v5352_v27 }
 0x1d8   : > { %v2163_v44 = vand.u32 2147483647, %v4010_v20  ;;  %v2183_v25 = vand.u32 2147483647, %v4014_v29  ;;  %v2194_v26 = vpack.c.bf16 %v2190_v14, %v2190_v14  ;;  %v2334_v39 = vunpack.c.l.b16 %v5355_v28  ;;  %v4550_v28 = vld [vmem:[#allocation5 + $0x148] sm:$0xff] }
 0x1d9   : > { %v2112_v21 = vmin.f32 %v2108_v32, 1.0  ;;  %v2127_v40 = vsub.f32 1.0, %v2123_v33  ;;  %v2147_v55 = vsub.f32 1.0, %v2143_v35  ;;  %v2346_v50 = vunpack.c.l.b16 %v5358_v11  ;;  %v4542_v20 = vld [vmem:[#allocation5 + $0x108] sm:$0xff]  ;;  %3183 = vmatpush.bf16.msrb.mxu2 %v4550_v28 }
 0x1da   : > { %v2084_v49 = vpop.f32.mrf.mxu3  ;;  %v2167_v46 = vsub.f32 1.0, %v2163_v44  ;;  %v2187_v52 = vsub.f32 1.0, %v2183_v25  ;;  %v2358_v0 = vunpack.c.l.b16 %v2194_v26  ;;  %v5373_v4 = vadd.f32 0.5, %v5346_v9  ;;  %v4558_v32 = vld [vmem:[#allocation5 + $0x188] sm:$0xff]  ;;  %3164 = vmatpush.bf16.msrb.mxu1 %v4542_v20  ;;  %v5388_v26 = vld [vmem:[#allocation5 + $0x1c0] sm:$0xff] }
 0x1db   : > { %v5367_v37 = vmul.f32 4.5, %v2112_v21  ;;  %v2085_v53 = vadd.f32 %v2084_v49, %v2066_v41  ;;  %v2131_v56 = vmax.f32 %v2127_v40, 0.0  ;;  %v2151_v57 = vmax.f32 %v2147_v55, 0.0  ;;  %v5379_v33 = vld [vmem:[#allocation5 + $0x1c8] sm:$0xff]  ;;  %v4549_v41 = vld [vmem:[#allocation5 + $0x140] sm:$0xff]  ;;  %3202 = vmatpush.bf16.msrb.mxu3 %v4558_v32 }
 0x1dc   : > { %v2171_v62 = vmax.f32 %v2167_v46, 0.0  ;;  %v2191_v63 = vmax.f32 %v2187_v52, 0.0  ;;  %v2203_v44 = vand.u32 2147483647, %v5373_v4  ;;  %v4557_v55 = vld [vmem:[#allocation5 + $0x180] sm:$0xff]  ;;  %3221 = vmatpush.bf16.msra.mxu0 %v5379_v33  ;;  %v4588_v52 = vld [vmem:[#allocation5 + $0x278] sm:$0xff] }
 0x1dd   : > { %v2104_v34 = vadd.f32 %v2103_v61, %v2085_v53  ;;  %v2135_v51 = vpack.c.bf16 %v2131_v56, %v2131_v56  ;;  %v2155_v59 = vpack.c.bf16 %v2151_v57, %v2151_v57  ;;  %v4003_v5 = vadd.f32 4.5, %v5367_v37  ;;  %3184 = vmatpush.bf16.msrb.mxu2 %v4549_v41 }
 0x1de   : > { %v2175_v6 = vpack.c.bf16 %v2171_v62, %v2171_v62  ;;  %v2195_v7 = vpack.c.bf16 %v2191_v63, %v2191_v63  ;;  %v4007_v42 = vadd.f32 3.5, %v5367_v37  ;;  %v4011_v8 = vadd.f32 2.5, %v5367_v37  ;;  %v4580_v63 = vld [vmem:[#allocation5 + $0x238] sm:$0xff] }
 0x1df   : > { %v2109_v10 = vmax.f32 %v2104_v34, 0.0  ;;  %v2323_v12 = vunpack.c.l.b16 %v2135_v51  ;;  %v2335_v15 = vunpack.c.l.b16 %v2155_v59  ;;  %v2124_v16 = vand.u32 2147483647, %v4003_v5  ;;  %3203 = vmatpush.bf16.msrb.mxu3 %v4557_v55 }
 0x1e0   : > { %v2347_v13 = vunpack.c.l.b16 %v2175_v6  ;;  %v2359_v17 = vunpack.c.l.b16 %v2195_v7  ;;  %v2144_v14 = vand.u32 2147483647, %v4007_v42  ;;  %v2164_v18 = vand.u32 2147483647, %v4011_v8  ;;  %3222 = vmatpush.bf16.msra.mxu0 %v5388_v26 }
 0x1e1   : > { %v2113_v23 = vmin.f32 %v2109_v10, 1.0  ;;  %v2326_v24 = vpack.c.b16 %v2323_v12, %v2322_v43  ;;  %v2338_v27 = vpack.c.b16 %v2335_v15, %v2334_v39  ;;  %v2128_v19 = vsub.f32 1.0, %v2124_v16  ;;  %v4541_v43 = vld [vmem:[#allocation5 + $0x100] sm:$0xff]  ;;  %v4587_v12 = vld [vmem:[#allocation5 + $0x270] sm:$0xff] }
 0x1e2   : > { %v2350_v11 = vpack.c.b16 %v2347_v13, %v2346_v50  ;;  %v2362_v29 = vpack.c.b16 %v2359_v17, %v2358_v0  ;;  %v2148_v54 = vsub.f32 1.0, %v2144_v14  ;;  %v2168_v31 = vsub.f32 1.0, %v2164_v18  ;;  %3165 = vmatpush.bf16.msrb.mxu1 %v4541_v43  ;;  %v4579_v14 = vld [vmem:[#allocation5 + $0x230] sm:$0xff] }
 0x1e3   : > { %v5381_v35 = vmul.f32 4.5, %v2113_v23  ;;  %3090 = vmatmul.bf16.vlgmr.msra.gmra.mxu1 %v2326_v24  ;;  %3109 = vmatmul.bf16.vlgmr.msra.gmra.mxu2 %v2338_v27  ;;  %v4015_v36 = vadd.f32 1.5, %v5367_v37  ;;  %v2132_v45 = vmax.f32 %v2128_v19, 0.0  ;;  %v4017_v61 = vadd.f32 0.5, %v5332_v47 }
 0x1e4   : > { %3128 = vmatmul.bf16.vlgmr.msra.gmra.mxu3 %v2350_v11  ;;  %3147 = vmatmul.bf16.vlgmr.msrb.gmra.mxu0 %v2362_v29  ;;  %v2152_v49 = vmax.f32 %v2148_v54, 0.0  ;;  %v2172_v39 = vmax.f32 %v2168_v31, 0.0  ;;  %v4021_v62 = vadd.f32 -0.5, %v5332_v47  ;;  %v4022_v6 = vadd.f32 -0.5, %v5346_v9 }
 0x1e5   : > { %v4004_v25 = vadd.f32 4.5, %v5381_v35  ;;  %v4008_v21 = vadd.f32 3.5, %v5381_v35  ;;  %v4012_v40 = vadd.f32 2.5, %v5381_v35  ;;  %v4016_v46 = vadd.f32 1.5, %v5381_v35  ;;  %3253 = vmatpush.bf16.msra.mxu2 %v4588_v52  ;;  %4590 = vmatpush.bf16.msra.mxu3 %v5329_v38 }
 0x1e6   : > { %v2184_v50 = vand.u32 2147483647, %v4015_v36  ;;  %v2136_v1 = vpack.c.bf16 %v2132_v45, %v2132_v45  ;;  %v2156_v51 = vpack.c.bf16 %v2152_v49, %v2152_v49  ;;  %v2176_v10 = vpack.c.bf16 %v2172_v39, %v2172_v39  ;;  %3234 = vmatpush.bf16.msra.mxu1 %v4580_v63 }
 0x1e7   : > { %v2125_v53 = vand.u32 2147483647, %v4004_v25  ;;  %v2145_v56 = vand.u32 2147483647, %v4008_v21  ;;  %v2165_v57 = vand.u32 2147483647, %v4012_v40 }
 0x1e8   : > { %v2185_v60 = vand.u32 2147483647, %v4016_v46  ;;  %v2188_v58 = vsub.f32 1.0, %v2184_v50  ;;  %v2202_v13 = vand.u32 2147483647, %v4017_v61  ;;  %v2207_v17 = vsub.f32 1.0, %v2203_v44 }
 0x1e9   : > { %v2129_v0 = vsub.f32 1.0, %v2125_v53  ;;  %v2149_v4 = vsub.f32 1.0, %v2145_v56  ;;  %v2169_v34 = vsub.f32 1.0, %v2165_v57  ;;  %v2324_v23 = vunpack.c.l.b16 %v2136_v1  ;;  %3254 = vmatpush.bf16.msra.mxu2 %v4587_v12  ;;  %4591 = vmatpush.bf16.msra.mxu3 %v5336_v30  ;;  %v4586_v40 = vld [vmem:[#allocation5 + $0x268] sm:$0xff]  ;;  %v4585_v61 = vld [vmem:[#allocation5 + $0x260] sm:$0xff] }
 0x1ea   : > { %v2189_v59 = vsub.f32 1.0, %v2185_v60  ;;  %v2192_v5 = vmax.f32 %v2188_v58, 0.0  ;;  %v2336_v19 = vunpack.c.l.b16 %v2156_v51  ;;  %v2222_v20 = vand.u32 2147483647, %v4021_v62  ;;  %3235 = vmatpush.bf16.msra.mxu1 %v4579_v14  ;;  %v4578_v50 = vld [vmem:[#allocation5 + $0x228] sm:$0xff] }
 0x1eb   : > { %v2133_v7 = vmax.f32 %v2129_v0, 0.0  ;;  %v2153_v42 = vmax.f32 %v2149_v4, 0.0  ;;  %v2173_v8 = vmax.f32 %v2169_v34, 0.0  ;;  %v2223_v11 = vand.u32 2147483647, %v4022_v6 }
 0x1ec   : > { %v2193_v15 = vmax.f32 %v2189_v59, 0.0  ;;  %v2196_v16 = vpack.c.bf16 %v2192_v5, %v2192_v5  ;;  %v2348_v31 = vunpack.c.l.b16 %v2176_v10  ;;  %v4025_v43 = vadd.f32 -1.5, %v5332_v47  ;;  %v4577_v59 = vld [vmem:[#allocation5 + $0x220] sm:$0xff] }
 0x1ed   : > { %v2137_v18 = vpack.c.bf16 %v2133_v7, %v2133_v7  ;;  %v2157_v24 = vpack.c.bf16 %v2153_v42, %v2153_v42  ;;  %v2177_v27 = vpack.c.bf16 %v2173_v8, %v2173_v8  ;;  %v2227_v41 = vsub.f32 1.0, %v2223_v11  ;;  %3255 = vmatpush.bf16.msra.mxu2 %v4586_v40  ;;  %4592 = vmatpush.bf16.msra.mxu3 %v5344_v2  ;;  %v4575_v40 = vld [vmem:[#allocation5 + $0x210] sm:$0xff] }
 0x1ee   : > { %v2197_v28 = vpack.c.bf16 %v2193_v15, %v2193_v15  ;;  %v2360_v38 = vunpack.c.l.b16 %v2196_v16  ;;  %v2206_v21 = vsub.f32 1.0, %v2202_v13  ;;  %v2226_v49 = vsub.f32 1.0, %v2222_v20  ;;  %3236 = vmatpush.bf16.msra.mxu1 %v4578_v50 }
 0x1ef   : > { %v2325_v29 = vunpack.c.l.b16 %v2137_v18  ;;  %v2337_v54 = vunpack.c.l.b16 %v2157_v24  ;;  %v2349_v32 = vunpack.c.l.b16 %v2177_v27  ;;  %v4026_v39 = vadd.f32 -1.5, %v5346_v9  ;;  %v4584_v18 = vld [vmem:[#allocation5 + $0x258] sm:$0xff] }
 0x1f0   : > { %v2361_v36 = vunpack.c.l.b16 %v2197_v28  ;;  %v2242_v46 = vand.u32 2147483647, %v4025_v43  ;;  %v2211_v30 = vmax.f32 %v2207_v17, 0.0  ;;  %v4029_v52 = vadd.f32 -2.5, %v5332_v47  ;;  %v4583_v43 = vld [vmem:[#allocation5 + $0x250] sm:$0xff] }
 0x1f1   : > { %v2327_v44 = vpack.c.b16 %v2325_v29, %v2324_v23  ;;  %v2339_v25 = vpack.c.b16 %v2337_v54, %v2336_v19  ;;  %v2351_v45 = vpack.c.b16 %v2349_v32, %v2348_v31  ;;  %v4030_v53 = vadd.f32 -2.5, %v5346_v9  ;;  %3256 = vmatpush.bf16.msra.mxu2 %v4585_v61  ;;  %4593 = vmatpush.bf16.msra.mxu3 %v5349_v22  ;;  %v4576_v19 = vld [vmem:[#allocation5 + $0x218] sm:$0xff] }
 0x1f2   : > { %v2363_v55 = vpack.c.b16 %v2361_v36, %v2360_v38  ;;  %v4019_v56 = vadd.f32 0.5, %v5367_v37  ;;  %v2231_v57 = vmax.f32 %v2227_v41, 0.0  ;;  %v2243_v60 = vand.u32 2147483647, %v4026_v39  ;;  %3237 = vmatpush.bf16.msra.mxu1 %v4577_v59 }
 0x1f3   : > { %3095 = vmatmul.bf16.gmra.mxu1 %v2327_v44  ;;  %3114 = vmatmul.bf16.gmra.mxu2 %v2339_v25  ;;  %v2246_v58 = vsub.f32 1.0, %v2242_v46  ;;  %v4020_v62 = vadd.f32 0.5, %v5381_v35  ;;  %v2262_v63 = vand.u32 2147483647, %v4029_v52  ;;  %v2263_v0 = vand.u32 2147483647, %v4030_v53 }
 0x1f4   : > { %3133 = vmatmul.bf16.gmra.mxu3 %v2351_v45  ;;  %3152 = vmatmul.bf16.gmra.mxu0 %v2363_v55  ;;  %v2204_v1 = vand.u32 2147483647, %v4019_v56  ;;  %v2210_v4 = vmax.f32 %v2206_v21, 0.0  ;;  %v2230_v34 = vmax.f32 %v2226_v49, 0.0  ;;  %v2247_v51 = vsub.f32 1.0, %v2243_v60 }
 0x1f5   : > { %v2205_v5 = vand.u32 2147483647, %v4020_v62  ;;  %v2215_v6 = vpack.c.bf16 %v2211_v30, %v2211_v30  ;;  %v2250_v7 = vmax.f32 %v2246_v58, 0.0  ;;  %v2266_v42 = vsub.f32 1.0, %v2262_v63  ;;  %3257 = vmatpush.bf16.msra.mxu2 %v4584_v18  ;;  %4594 = vmatpush.bf16.msra.mxu3 %v5363_v48  ;;  %v4582_v48 = vld [vmem:[#allocation5 + $0x248] sm:$0xff] }
 0x1f6   : > { %v2267_v8 = vsub.f32 1.0, %v2263_v0  ;;  %v2235_v10 = vpack.c.bf16 %v2231_v57, %v2231_v57  ;;  %v2251_v12 = vmax.f32 %v2247_v51, 0.0  ;;  %v4023_v16 = vadd.f32 -0.5, %v5367_v37  ;;  %3238 = vmatpush.bf16.msra.mxu1 %v4576_v19  ;;  %v4574_v0 = vld [vmem:[#allocation5 + $0x208] sm:$0xff] }
 0x1f7   : > { %v2209_v15 = vsub.f32 1.0, %v2205_v5  ;;  %v2270_v13 = vmax.f32 %v2266_v42, 0.0  ;;  %v2208_v2 = vsub.f32 1.0, %v2204_v1  ;;  %v4024_v14 = vadd.f32 -0.5, %v5381_v35  ;;  %v4581_v42 = vld [vmem:[#allocation5 + $0x240] sm:$0xff] }
 0x1f8   : > { %v2271_v17 = vmax.f32 %v2267_v8, 0.0  ;;  %v2214_v23 = vpack.c.bf16 %v2210_v4, %v2210_v4  ;;  %v2234_v24 = vpack.c.bf16 %v2230_v34, %v2230_v34  ;;  %v2255_v27 = vpack.c.bf16 %v2251_v12, %v2251_v12 }
 0x1f9   : > { %v2254_v28 = vpack.c.bf16 %v2250_v7, %v2250_v7  ;;  %v2213_v11 = vmax.f32 %v2209_v15, 0.0  ;;  %v2225_v29 = vand.u32 2147483647, %v4024_v14  ;;  %v2371_v54 = vunpack.c.l.b16 %v2215_v6  ;;  %3258 = vmatpush.bf16.msra.mxu2 %v4583_v43  ;;  %4595 = vmatpush.bf16.msra.mxu3 %v5370_v3 }
 0x1fa   : > { %v2275_v20 = vpack.c.bf16 %v2271_v17, %v2271_v17  ;;  %v2274_v31 = vpack.c.bf16 %v2270_v13, %v2270_v13  ;;  %v2224_v32 = vand.u32 2147483647, %v4023_v16  ;;  %v4027_v38 = vadd.f32 -1.5, %v5367_v37  ;;  %3239 = vmatpush.bf16.msra.mxu1 %v4575_v40  ;;  %v4573_v16 = vld [vmem:[#allocation5 + $0x200] sm:$0xff] }
 0x1fb   : > { %v2383_v36 = vunpack.c.l.b16 %v2235_v10  ;;  %v2395_v22 = vunpack.c.l.b16 %v2255_v27  ;;  %v2212_v41 = vmax.f32 %v2208_v2, 0.0  ;;  %v2370_v44 = vunpack.c.l.b16 %v2214_v23 }
 0x1fc   : > { %v2407_v25 = vunpack.c.l.b16 %v2275_v20  ;;  %v2229_v45 = vsub.f32 1.0, %v2225_v29  ;;  %v4028_v21 = vadd.f32 -1.5, %v5381_v35  ;;  %v2382_v55 = vunpack.c.l.b16 %v2234_v24 }
 0x1fd   : > { %v2394_v49 = vunpack.c.l.b16 %v2254_v28  ;;  %v2217_v39 = vpack.c.bf16 %v2213_v11, %v2213_v11  ;;  %v2244_v46 = vand.u32 2147483647, %v4027_v38  ;;  %v2374_v50 = vpack.c.b16 %v2371_v54, %v2370_v44  ;;  %3259 = vmatpush.bf16.msra.mxu2 %v4582_v48  ;;  %4596 = vmatpush.bf16.msra.mxu3 %v5379_v33 }
 0x1fe   : > { %v2406_v30 = vunpack.c.l.b16 %v2274_v31  ;;  %v2228_v52 = vsub.f32 1.0, %v2224_v32  ;;  %v2245_v53 = vand.u32 2147483647, %v4028_v21  ;;  %v2386_v56 = vpack.c.b16 %v2383_v36, %v2382_v55  ;;  %3240 = vmatpush.bf16.msra.mxu1 %v4574_v0 }
 0x1ff   : > { %v2398_v57 = vpack.c.b16 %v2395_v22, %v2394_v49  ;;  %v2216_v60 = vpack.c.bf16 %v2212_v41, %v2212_v41  ;;  %v4033_v58 = vadd.f32 -3.5, %v5332_v47  ;;  %v2233_v62 = vmax.f32 %v2229_v45, 0.0 }
 0x200   : > { %v2410_v61 = vpack.c.b16 %v2407_v25, %v2406_v30  ;;  %v2249_v63 = vsub.f32 1.0, %v2245_v53  ;;  %v4034_v1 = vadd.f32 -3.5, %v5346_v9  ;;  %v2373_v4 = vunpack.c.l.b16 %v2217_v39 }
 0x201   : > { %v2248_v34 = vsub.f32 1.0, %v2244_v46  ;;  %v2282_v51 = vand.u32 2147483647, %v4033_v58  ;;  %v2232_v59 = vmax.f32 %v2228_v52, 0.0  ;;  %v5415_v3 = vadd.f32 -2.5, %v5367_v37  ;;  %3260 = vmatpush.bf16.msra.mxu2 %v4581_v42  ;;  %4597 = vmatpush.bf16.msra.mxu3 %v5388_v26 }
 0x202   : > { %v2283_v5 = vand.u32 2147483647, %v4034_v1  ;;  %v4037_v6 = vadd.f32 -4.5, %v5332_v47  ;;  %v2372_v7 = vunpack.c.l.b16 %v2216_v60  ;;  %v4032_v8 = vadd.f32 -2.5, %v5381_v35  ;;  %3241 = vmatpush.bf16.msra.mxu1 %v4573_v16 }
 0x203   : > { %3166 = vmatmul.bf16.vlgmr.msrb.gmra.mxu1 %v2374_v50  ;;  %3185 = vmatmul.bf16.vlgmr.msrb.gmra.mxu2 %v2386_v56  ;;  %v2286_v10 = vsub.f32 1.0, %v2282_v51  ;;  %v2237_v12 = vpack.c.bf16 %v2233_v62, %v2233_v62  ;;  %v2253_v15 = vmax.f32 %v2249_v63, 0.0  ;;  %v4038_v17 = vadd.f32 -4.5, %v5346_v9 }
 0x204   : > { %3204 = vmatmul.bf16.vlgmr.msrb.gmra.mxu3 %v2398_v57  ;;  %3223 = vmatmul.bf16.vlgmr.msra.gmra.mxu0 %v2410_v61  ;;  %v2287_v13 = vsub.f32 1.0, %v2283_v5  ;;  %v2375_v2 = vpack.c.b16 %v2373_v4, %v2372_v7  ;;  %v2252_v14 = vmax.f32 %v2248_v34, 0.0  ;;  %v2302_v23 = vand.u32 2147483647, %v4037_v6 }
 0x205   : > { %v2290_v18 = vmax.f32 %v2286_v10, 0.0  ;;  %v2236_v47 = vpack.c.bf16 %v2232_v59, %v2232_v59  ;;  %v2264_v24 = vand.u32 2147483647, %v5415_v3  ;;  %v2303_v33 = vand.u32 2147483647, %v4038_v17 }
 0x206   : > { %v2291_v27 = vmax.f32 %v2287_v13, 0.0  ;;  %v2265_v19 = vand.u32 2147483647, %v4032_v8  ;;  %v2306_v20 = vsub.f32 1.0, %v2302_v23  ;;  %v4035_v11 = vadd.f32 -3.5, %v5367_v37 }
 0x207   : > { %v2294_v28 = vpack.c.bf16 %v2290_v18, %v2290_v18  ;;  %v2385_v29 = vunpack.c.l.b16 %v2237_v12  ;;  %v2257_v54 = vpack.c.bf16 %v2253_v15, %v2253_v15  ;;  %v2307_v31 = vsub.f32 1.0, %v2303_v33 }
 0x208   : > { %v2295_v9 = vpack.c.bf16 %v2291_v27, %v2291_v27  ;;  %v2256_v32 = vpack.c.bf16 %v2252_v14, %v2252_v14  ;;  %v2310_v38 = vmax.f32 %v2306_v20, 0.0  ;;  %v4036_v36 = vadd.f32 -3.5, %v5381_v35 }
 0x209   : > { %v2284_v22 = vand.u32 2147483647, %v4035_v11  ;;  %v2418_v41 = vunpack.c.l.b16 %v2294_v28  ;;  %v2311_v44 = vmax.f32 %v2307_v31, 0.0  ;;  %v4039_v26 = vadd.f32 -4.5, %v5367_v37 }
 0x20a   : > { %v2419_v43 = vunpack.c.l.b16 %v2295_v9  ;;  %v2314_v25 = vpack.c.bf16 %v2310_v38, %v2310_v38  ;;  %v2285_v45 = vand.u32 2147483647, %v4036_v36  ;;  %v4040_v40 = vadd.f32 -4.5, %v5381_v35 }
 0x20b   : > { %v2288_v21 = vsub.f32 1.0, %v2284_v22  ;;  %v2397_v55 = vunpack.c.l.b16 %v2257_v54  ;;  %v2315_v39 = vpack.c.bf16 %v2311_v44, %v2311_v44  ;;  %v2304_v46 = vand.u32 2147483647, %v4039_v26 }
 0x20c   : > { %v2422_v49 = vpack.c.b16 %v2419_v43, %v2418_v41  ;;  %v2384_v50 = vunpack.c.l.b16 %v2236_v47  ;;  %v2289_v30 = vsub.f32 1.0, %v2285_v45  ;;  %v2305_v53 = vand.u32 2147483647, %v4040_v40  ;;  %v4665_v41 = vld [vmem:[%s5479_s6] ss:$0 sm:$0xff] }
 0x20d   : > { %v2292_v52 = vmax.f32 %v2288_v21, 0.0  ;;  %v2396_v56 = vunpack.c.l.b16 %v2256_v32  ;;  %v2430_v57 = vunpack.c.l.b16 %v2314_v25  ;;  %v2431_v60 = vunpack.c.l.b16 %v2315_v39 }
 0x20e   : > { %v2308_v48 = vsub.f32 1.0, %v2304_v46  ;;  %v2387_v58 = vpack.c.b16 %v2385_v29, %v2384_v50  ;;  %v2293_v61 = vmax.f32 %v2289_v30, 0.0  ;;  %v2309_v62 = vsub.f32 1.0, %v2305_v53 }
 0x20f   : > { %v2296_v37 = vpack.c.bf16 %v2292_v52, %v2292_v52  ;;  %v2399_v63 = vpack.c.b16 %v2397_v55, %v2396_v56  ;;  %v2269_v0 = vsub.f32 1.0, %v2265_v19  ;;  %v2434_v1 = vpack.c.b16 %v2431_v60, %v2430_v57 }
 0x210   : > { %v2312_v35 = vmax.f32 %v2308_v48, 0.0  ;;  %v2297_v4 = vpack.c.bf16 %v2293_v61, %v2293_v61  ;;  %v2313_v34 = vmax.f32 %v2309_v62, 0.0  ;;  %v2268_v51 = vsub.f32 1.0, %v2264_v24 }
 0x211   : > { %v2420_v3 = vunpack.c.l.b16 %v2296_v37  ;;  %v2273_v7 = vmax.f32 %v2269_v0, 0.0 }
 0x212   : > { %v2316_v59 = vpack.c.bf16 %v2312_v35, %v2312_v35  ;;  %v2421_v5 = vunpack.c.l.b16 %v2297_v4  ;;  %v2317_v6 = vpack.c.bf16 %v2313_v34, %v2313_v34  ;;  %v2272_v12 = vmax.f32 %v2268_v51, 0.0 }
 0x213   : > { %3171 = vmatmul.bf16.gmra.mxu1 %v2375_v2  ;;  %3190 = vmatmul.bf16.gmra.mxu2 %v2387_v58  ;;  %v2277_v16 = vpack.c.bf16 %v2273_v7, %v2273_v7 }
 0x214   : > { %3209 = vmatmul.bf16.gmra.mxu3 %v2399_v63  ;;  %v2423_v42 = vpack.c.b16 %v2421_v5, %v2420_v3  ;;  %v2432_v8 = vunpack.c.l.b16 %v2316_v59  ;;  %v2433_v10 = vunpack.c.l.b16 %v2317_v6  ;;  %v2276_v13 = vpack.c.bf16 %v2272_v12, %v2272_v12 }
 0x215   : > { %v2409_v17 = vunpack.c.l.b16 %v2277_v16 }
 0x216   : > { %v2435_v15 = vpack.c.b16 %v2433_v10, %v2432_v8  ;;  %v2408_v14 = vunpack.c.l.b16 %v2276_v13 }
 0x218   : > { %v2411_v2 = vpack.c.b16 %v2409_v17, %v2408_v14 }
 0x223   : > { %3242 = vmatmul.bf16.vlgmr.msra.gmra.mxu1 %v2422_v49  ;;  %3261 = vmatmul.bf16.vlgmr.msra.gmra.mxu2 %v2434_v1 }
 0x224   : > { %3228 = vmatmul.bf16.vlgmr.msra.gmra.mxu3 %v2411_v2 }
 0x233   : > { %3247 = vmatmul.bf16.gmra.mxu1 %v2423_v42  ;;  %3266 = vmatmul.bf16.gmra.mxu2 %v2435_v15 }
 0x260   : > { %v3091_v18 = vpop.f32.mrf.mxu1 }
 0x261   : > { %v3148_v11 = vpop.f32.mrf.mxu0  ;;  %v3092_v44 = vadd.f32 %v4665_v41, %v3091_v18 }
 0x266   : > { %v3110_v23 = vpop.f32.mrf.mxu2 }
 0x267   : > { %v3129_v47 = vpop.f32.mrf.mxu3  ;;  %v3111_v25 = vadd.f32 %v3110_v23, %v3092_v44 }
 0x268   : > { %v3093_v24 = vpop.f32.mrf.mxu1 }
 0x269   : > { %v3150_v32 = vpop.f32.mrf.mxu0  ;;  %v3130_v40 = vadd.f32 %v3129_v47, %v3111_v25  ;;  %v3094_v55 = vadd.f32 %v4665_v41, %v3093_v24 }
 0x26b   : > { %v3149_v50 = vadd.f32 %v3148_v11, %v3130_v40 }
 0x26e   : > { %v3112_v27 = vpop.f32.mrf.mxu2 }
 0x26f   : > { %v3131_v33 = vpop.f32.mrf.mxu3  ;;  %v3113_v46 = vadd.f32 %v3112_v27, %v3094_v55 }
 0x270   : > { %v3096_v19 = vpop.f32.mrf.mxu1 }
 0x271   : > { %v3153_v43 = vpop.f32.mrf.mxu0  ;;  %v3132_v56 = vadd.f32 %v3131_v33, %v3113_v46  ;;  %v3097_v48 = vadd.f32 %v4665_v41, %v3096_v19 }
 0x273   : > { %v3151_v61 = vadd.f32 %v3150_v32, %v3132_v56 }
 0x276   : > { %v3115_v28 = vpop.f32.mrf.mxu2 }
 0x277   : > { %v3134_v20 = vpop.f32.mrf.mxu3  ;;  %v3116_v63 = vadd.f32 %v3115_v28, %v3097_v48 }
 0x278   : > { %v3098_v29 = vpop.f32.mrf.mxu1 }
 0x279   : > { %v3155_v49 = vpop.f32.mrf.mxu0  ;;  %v3135_v34 = vadd.f32 %v3134_v20, %v3116_v63  ;;  %v3099_v3 = vadd.f32 %v4665_v41, %v3098_v29 }
 0x27b   : > { %v3154_v8 = vadd.f32 %v3153_v43, %v3135_v34 }
 0x27e   : > { %v3117_v54 = vpop.f32.mrf.mxu2 }
 0x27f   : > { %v3136_v9 = vpop.f32.mrf.mxu3  ;;  %v3118_v42 = vadd.f32 %v3117_v54, %v3099_v3 }
 0x280   : > { %v3167_v31 = vpop.f32.mrf.mxu1 }
 0x281   : > { %v3168_v52 = vadd.f32 %v3167_v31, %v3149_v50  ;;  %v3224_v37 = vpop.f32.mrf.mxu0  ;;  %v3137_v16 = vadd.f32 %v3136_v9, %v3118_v42 }
 0x283   : > { %v3156_v24 = vadd.f32 %v3155_v49, %v3137_v16 }
 0x286   : > { %v3186_v38 = vpop.f32.mrf.mxu2 }
 0x287   : > { %v3205_v36 = vpop.f32.mrf.mxu3  ;;  %v3187_v57 = vadd.f32 %v3186_v38, %v3168_v52 }
 0x288   : > { %v3169_v22 = vpop.f32.mrf.mxu1 }
 0x289   : > { %v3206_v58 = vadd.f32 %v3205_v36, %v3187_v57  ;;  %v3170_v0 = vadd.f32 %v3169_v22, %v3151_v61  ;;  %v3226_v10 = vpop.f32.mrf.mxu0 }
 0x28b   : > { %v3225_v35 = vadd.f32 %v3224_v37, %v3206_v58 }
 0x28e   : > { %v3188_v26 = vpop.f32.mrf.mxu2 }
 0x28f   : > { %v3207_v45 = vpop.f32.mrf.mxu3  ;;  %v3189_v1 = vadd.f32 %v3188_v26, %v3170_v0 }
 0x290   : > { %v3172_v21 = vpop.f32.mrf.mxu1 }
 0x291   : > { %v3208_v5 = vadd.f32 %v3207_v45, %v3189_v1  ;;  %v3173_v12 = vadd.f32 %v3172_v21, %v3154_v8 }
 0x293   : > { %v3227_v15 = vadd.f32 %v3226_v10, %v3208_v5 }
 0x296   : > { %v3191_v39 = vpop.f32.mrf.mxu2 }
 0x297   : > { %v3210_v53 = vpop.f32.mrf.mxu3  ;;  %v3192_v13 = vadd.f32 %v3191_v39, %v3173_v12 }
 0x298   : > { %v3174_v30 = vpop.f32.mrf.mxu1 }
 0x299   : > { %v3211_v47 = vadd.f32 %v3210_v53, %v3192_v13  ;;  %v3175_v27 = vadd.f32 %v3174_v30, %v3156_v24 }
 0x29e   : > { %v3193_v60 = vpop.f32.mrf.mxu2 }
 0x29f   : > { %v3212_v4 = vpop.f32.mrf.mxu3  ;;  %v3194_v19 = vadd.f32 %v3193_v60, %v3175_v27 }
 0x2a0   : > { %v3243_v62 = vpop.f32.mrf.mxu1 }
 0x2a1   : > { %v3244_v51 = vadd.f32 %v3243_v62, %v3225_v35  ;;  %v3213_v54 = vadd.f32 %v3212_v4, %v3194_v19 }
 0x2a6   : > { %v3262_v59 = vpop.f32.mrf.mxu2 }
 0x2a7   : > { %v3263_v6 = vadd.f32 %v3262_v59, %v3244_v51  ;;  %v3229_v14 = vpop.f32.mrf.mxu3 }
 0x2a8   : > { %v3245_v7 = vpop.f32.mrf.mxu1  ;;  %v3230_v33 = vadd.f32 %v3229_v14, %v3211_v47 }
 0x2a9   : > { %3272 = vst [vmem:[%s5433_s17] sm:$0xff] %v3263_v6  ;;  %v3246_v17 = vadd.f32 %v3245_v7, %v3227_v15 }
 0x2ae   : > { %v3264_v2 = vpop.f32.mrf.mxu2 }
 0x2af   : > { %v3265_v18 = vadd.f32 %v3264_v2, %v3246_v17  ;;  %v3231_v29 = vpop.f32.mrf.mxu3 }
 0x2b0   : > { %v3248_v23 = vpop.f32.mrf.mxu1  ;;  %v3232_v31 = vadd.f32 %v3231_v29, %v3213_v54 }
 0x2b1   : > { %3273 = vst [vmem:[%s5433_s17 + $0x8] sm:$0xff] %v3265_v18  ;;  %v3249_v28 = vadd.f32 %v3248_v23, %v3230_v33 }
 0x2b6   : > { %v3267_v20 = vpop.f32.mrf.mxu2 }
 0x2b7   : > { %v3268_v11 = vadd.f32 %v3267_v20, %v3249_v28 }
 0x2b8   : > { %v3250_v9 = vpop.f32.mrf.mxu1 }
 0x2b9   : > { %3274 = vst [vmem:[%s5433_s17 + $0x10] sm:$0xff] %v3268_v11  ;;  %v3251_v32 = vadd.f32 %v3250_v9, %v3232_v31 }
 0x2be   : > { %v3269_v38 = vpop.f32.mrf.mxu2 }
 0x2bf   : > { %v3270_v36 = vadd.f32 %v3269_v38, %v3251_v32 }
 0x2c1   : > { %3275 = vst [vmem:[%s5433_s17 + $0x18] sm:$0xff] %v3270_v36 }
 0x2c2   : > { %4753 = shalt.err (!%p4750_p8)
}
 0x2c3   : > { %s4802_s15 = smov 128   ;;  %s4803_s17 = smov 8  }
 0x2c4   : > { %4607 = dma.vmem_to_hbm [thread:$0]  (%p4882_p5), %s3290_s22, 512, %s3292_s23, %s3277_s28, %s4802_s15, %s4802_s15, %s4803_s17  }
 0x2c5 PF: > { %p4624_p9 = scmp.ge.s32.totalorder %s4796_s27, 2  ;;  %s3306_s19 = sand.u32 1, %s4784_s24  }
 0x2c6   : > { %s3307_s20 = scalar_lea.sflag [#allocation4], %s3306_s19 }
 0x2c7   : > { %p4617_p10 = pnand %p4624_p9, %p4886_p6 }
 0x2c9   : > { %p4618_p11 = pneg %p4617_p10 }
 0x2cb   : > { %4779 = dma.done.wait (%p4618_p11), %s3307_s20, 512  }
 0x2cc   : > { %4781 = vsyncadd (%p4618_p11), %s3307_s20, 4294966784  ;;  %p19_p12 = scmp.ge.s32.totalorder %s4869_s30, 6   ;;  %s5484_s24 = smov %s4788_s25 }
 0x2cd   : > { %s5485_s25 = smov %s4792_s26  ;;  %s5486_s26 = smov %s4880_s10 }
 0x2ce   : > { %s5487_s27 = smov %s4869_s30  ;;  %21 = sbr.rel (!%p19_p12) target bundleno = 5 (0x5), region = 92 }
 0x2d3   :  { %3313 = vsyncpa [#allocation3], 1 }
 0x2d4   :  { %3315 = vsyncpa [#allocation3 + $0x1], 1 }
 0x2d5   :  { %3316 = vsyncpa [#allocation6], 1 }
 0x2d6   :  { %3317 = vsyncpa [#allocation4], 1 }
 0x2d7   :  { %3319 = vsyncpa [#allocation4 + $0x1], 1 }

</bundles_post_ra>
